<compile_context>
chip_gen: v5e
topology: v5e:2x2
jax: 0.10.0
libtpu: 0.0.40
codegen_flags: <defaults>
</compile_context>

<pallas_src>
import math

import jax
import jax.numpy as jnp
from jax.experimental import pallas as pl
from jax.experimental.pallas import tpu as pltpu

HIDDEN = 8
ENC_IN = 7
DEC_IN = 6
OUT_F = 6


def _gru_step(gi_t, h, whh, bhn):
    """One PyTorch nn.GRU step with the input projection precomputed.

    gi_t : (B, 3H)  = x_t @ W_ih^T with b_ih (all gates) and b_hh (r, z) folded in
    h    : (B, H)
    whh  : (H, 3H)  = W_hh^T, column blocks [r | z | n]
    bhn  : (1, H)   = hidden-side n-gate bias (must be scaled by r, so per-step)
    """
    H = HIDDEN
    gh = jnp.dot(h, whh, preferred_element_type=jnp.float32)        # (B, 3H)
    rz = jax.nn.sigmoid(gi_t[:, :2 * H] + gh[:, :2 * H])            # one EUP push
    r = rz[:, :H]
    z = rz[:, H:]
    n = jnp.tanh(gi_t[:, 2 * H:] + r * (gh[:, 2 * H:] + bhn))
    return (1.0 - z) * n + z * h


def wheat_gru_kernel(enc_x_ref, dec_x_ref, h0_ref,
                     wih_e_ref, b_e_ref, whh_e_ref, bhn_e_ref,
                     wih_d_ref, b_d_ref, whh_d_ref, bhn_d_ref,
                     wout_ref, bout_ref,
                     out_ref):
    B = h0_ref.shape[0]
    T_enc = enc_x_ref.shape[0] // B
    T_dec = dec_x_ref.shape[0] // B

    h = h0_ref[...]                       # (B, H)
    whh_e = whh_e_ref[...]                # (H, 3H)
    bhn_e = bhn_e_ref[...]                # (1, H)
    whh_d = whh_d_ref[...]
    bhn_d = bhn_d_ref[...]

    # ---- input-side projections: off the recurrence critical path ----------
    # Two matmuls + one broadcast bias add each; nothing here depends on h, so
    # the scheduler can fully overlap them with the start of the recurrence.
    gi_enc = (jnp.dot(enc_x_ref[...], wih_e_ref[...],
                      preferred_element_type=jnp.float32) + b_e_ref[...])   # (T_enc*B, 3H)
    gi_dec = (jnp.dot(dec_x_ref[...], wih_d_ref[...],
                      preferred_element_type=jnp.float32) + b_d_ref[...])   # (T_dec*B, 3H)

    # ---- encoder GRU: fully unrolled, only final hidden state kept ----------
    for t in range(T_enc):
        gi_t = gi_enc[t * B:(t + 1) * B, :]   # static sublane slice, off-chain
        h = _gru_step(gi_t, h, whh_e, bhn_e)

    # ---- decoder GRU: fully unrolled, hidden states collected ---------------
    hs = []
    for t in range(T_dec):
        gi_t = gi_dec[t * B:(t + 1) * B, :]
        h = _gru_step(gi_t, h, whh_d, bhn_d)
        hs.append(h)

    # ---- output head hoisted out of the recurrence: one ReLU + one matmul ---
    hs_flat = jnp.concatenate(hs, axis=0)                         # (T_dec*B, H)
    y = (jnp.dot(jnp.maximum(hs_flat, 0.0), wout_ref[...],
                 preferred_element_type=jnp.float32) + bout_ref[...])
    out_ref[...] = y                                              # single store
    # NOTE: for production batch sizes, grid over batch chunks with
    # dimension_semantics=("parallel",) so v7x's second TensorCore is used.


def _pack_gru(w_ih, w_hh, b_ih, b_hh):
    """PyTorch-layout GRU weights -> kernel-ready arrays (done once at init).

    Returns:
      wih_t : (in, 3H)  W_ih^T, column blocks [r | z | n]
      b_row : (1, 3H)   b_ih (all gates) + b_hh (r, z only), folded into gi
      whh_t : (H, 3H)   W_hh^T
      bhn   : (1, H)    hidden-side n-gate bias (applied per step, scaled by r)
    """
    H = HIDDEN
    wih_t = w_ih.T.astype(jnp.float32)
    whh_t = w_hh.T.astype(jnp.float32)
    b_row = jnp.concatenate([b_ih[:2 * H] + b_hh[:2 * H],   # r, z biases fused
                             b_ih[2 * H:3 * H]]             # gi_n bias
                            ).astype(jnp.float32)[None, :]
    bhn = b_hh[2 * H:3 * H].astype(jnp.float32)[None, :]
    return wih_t, b_row, whh_t, bhn


def prepare_params(params):
    """One-time packing of PyTorch-style parameters into kernel-ready arrays."""
    wih_e, b_e, whh_e, bhn_e = _pack_gru(params["wih_e"], params["whh_e"],
                                         params["bih_e"], params["bhh_e"])
    wih_d, b_d, whh_d, bhn_d = _pack_gru(params["wih_d"], params["whh_d"],
                                         params["bih_d"], params["bhh_d"])
    return {
        "wih_e": wih_e, "b_e": b_e, "whh_e": whh_e, "bhn_e": bhn_e,
        "wih_d": wih_d, "b_d": b_d, "whh_d": whh_d, "bhn_d": bhn_d,
        "wout": params["wout"].T.astype(jnp.float32),      # (H, OUT_F)
        "bout": params["bout"].astype(jnp.float32)[None, :],  # (1, OUT_F)
    }


@jax.jit
def wheat_gru_forward(inputs, inputs_, h0, packed):
    """inputs: (B, T_enc, 7), inputs_: (B, T_dec, 6), h0: (B, 8) -> (B, T_dec, 6)."""
    B, T_enc, _ = inputs.shape
    _, T_dec, _ = inputs_.shape

    # Time-major flatten: row index = t*B + b (matches the kernel's gi slicing
    # and the flattened output ordering).
    enc_x = jnp.transpose(inputs, (1, 0, 2)).reshape(T_enc * B, ENC_IN).astype(jnp.float32)
    dec_x = jnp.transpose(inputs_, (1, 0, 2)).reshape(T_dec * B, DEC_IN).astype(jnp.float32)

    args = (
        enc_x, dec_x, h0.astype(jnp.float32),
        packed["wih_e"], packed["b_e"], packed["whh_e"], packed["bhn_e"],
        packed["wih_d"], packed["b_d"], packed["whh_d"], packed["bhn_d"],
        packed["wout"], packed["bout"],
    )

    out_flat = pl.pallas_call(
        wheat_gru_kernel,
        out_shape=jax.ShapeDtypeStruct((T_dec * B, OUT_F), jnp.float32),
        in_specs=[pl.BlockSpec(memory_space=pltpu.MemorySpace.VMEM)] * len(args),
        out_specs=pl.BlockSpec(memory_space=pltpu.MemorySpace.VMEM),
    )(*args)

    return out_flat.reshape(T_dec, B, OUT_F).transpose(1, 0, 2)   # (B, T_dec, 6)


def init_params(key):
    """Deterministic PyTorch-style uniform(-1/sqrt(H), 1/sqrt(H)) init."""
    k = 1.0 / math.sqrt(HIDDEN)
    keys = jax.random.split(key, 10)

    def u(kk, shape):
        return jax.random.uniform(kk, shape, jnp.float32, minval=-k, maxval=k)

    return {
        # encoder GRU (input 7 -> hidden 8)
        "wih_e": u(keys[0], (3 * HIDDEN, ENC_IN)),
        "whh_e": u(keys[1], (3 * HIDDEN, HIDDEN)),
        "bih_e": u(keys[2], (3 * HIDDEN,)),
        "bhh_e": u(keys[3], (3 * HIDDEN,)),
        # decoder GRU (input 6 -> hidden 8)
        "wih_d": u(keys[4], (3 * HIDDEN, DEC_IN)),
        "whh_d": u(keys[5], (3 * HIDDEN, HIDDEN)),
        "bih_d": u(keys[6], (3 * HIDDEN,)),
        "bhh_d": u(keys[7], (3 * HIDDEN,)),
        # output Linear(8 -> 6)
        "wout": u(keys[8], (OUT_F, HIDDEN)),
        "bout": u(keys[9], (OUT_F,)),
    }


def reference_forward(inputs, inputs_, h0, params):
    """Plain-JAX reference with un-fused PyTorch GRU semantics."""
    def cell(x, h, w_ih, w_hh, b_ih, b_hh):
        H = HIDDEN
        gi = x @ w_ih.T + b_ih
        gh = h @ w_hh.T + b_hh
        r = jax.nn.sigmoid(gi[:, :H] + gh[:, :H])
        z = jax.nn.sigmoid(gi[:, H:2 * H] + gh[:, H:2 * H])
        n = jnp.tanh(gi[:, 2 * H:] + r * gh[:, 2 * H:])
        return (1.0 - z) * n + z * h

    h = h0
    for t in range(inputs.shape[1]):
        h = cell(inputs[:, t, :], h, params["wih_e"], params["whh_e"],
                 params["bih_e"], params["bhh_e"])
    outs = []
    for t in range(inputs_.shape[1]):
        h = cell(inputs_[:, t, :], h, params["wih_d"], params["whh_d"],
                 params["bih_d"], params["bhh_d"])
        outs.append(h)
    outs = jnp.stack(outs, axis=1)                       # (B, T_dec, 8)
    return jnp.maximum(outs, 0.0) @ params["wout"].T + params["bout"]


if __name__ == "__main__":
    key = jax.random.PRNGKey(0)
    k_par, k_in, k_in2, k_h0 = jax.random.split(key, 4)

    B, T_ENC, T_DEC = 2, 8, 5
    params = init_params(k_par)
    packed = prepare_params(params)          # one-time packing, outside forward
    inputs = jax.random.normal(k_in, (B, T_ENC, ENC_IN), jnp.float32)
    inputs_ = jax.random.normal(k_in2, (B, T_DEC, DEC_IN), jnp.float32)
    # torch.randn(1, B, 8) initial hidden -> deterministic normal here (layer dim squeezed)
    h0 = jax.random.normal(k_h0, (B, HIDDEN), jnp.float32)

    out = wheat_gru_forward(inputs, inputs_, h0, packed)
    out = jax.block_until_ready(out)

    ref = reference_forward(inputs, inputs_, h0, params)
    assert out.shape == (B, T_DEC, OUT_F), out.shape
    assert jnp.allclose(out, ref, atol=1e-5, rtol=1e-5), float(jnp.max(jnp.abs(out - ref)))

    print("KERNEL_OK")
</pallas_src>

<mosaic_0001>
module attributes {stable_mosaic.version = 11 : i64} {
  func.func @wheat_gru_kernel(%arg0: memref<16x7xf32, #tpu.memory_space<vmem>>, %arg1: memref<10x6xf32, #tpu.memory_space<vmem>>, %arg2: memref<2x8xf32, #tpu.memory_space<vmem>>, %arg3: memref<7x24xf32, #tpu.memory_space<vmem>>, %arg4: memref<1x24xf32, #tpu.memory_space<vmem>>, %arg5: memref<8x24xf32, #tpu.memory_space<vmem>>, %arg6: memref<1x8xf32, #tpu.memory_space<vmem>>, %arg7: memref<6x24xf32, #tpu.memory_space<vmem>>, %arg8: memref<1x24xf32, #tpu.memory_space<vmem>>, %arg9: memref<8x24xf32, #tpu.memory_space<vmem>>, %arg10: memref<1x8xf32, #tpu.memory_space<vmem>>, %arg11: memref<8x6xf32, #tpu.memory_space<vmem>>, %arg12: memref<1x6xf32, #tpu.memory_space<vmem>>, %arg13: memref<10x6xf32, #tpu.memory_space<vmem>>) attributes {dimension_semantics = [], scalar_prefetch = 0 : i64, scratch_operands = 0 : i64, tpu.core_type = #tpu.core_type<tc>} {
    %c0 = arith.constant 0 : index
    %c0_0 = arith.constant 0 : index
    %0 = vector.load %arg2[%c0, %c0_0] : memref<2x8xf32, #tpu.memory_space<vmem>>, vector<2x8xf32>
    %c0_1 = arith.constant 0 : index
    %c0_2 = arith.constant 0 : index
    %1 = vector.load %arg5[%c0_1, %c0_2] : memref<8x24xf32, #tpu.memory_space<vmem>>, vector<8x24xf32>
    %c0_3 = arith.constant 0 : index
    %c0_4 = arith.constant 0 : index
    %2 = vector.load %arg6[%c0_3, %c0_4] : memref<1x8xf32, #tpu.memory_space<vmem>>, vector<1x8xf32>
    %c0_5 = arith.constant 0 : index
    %c0_6 = arith.constant 0 : index
    %3 = vector.load %arg9[%c0_5, %c0_6] : memref<8x24xf32, #tpu.memory_space<vmem>>, vector<8x24xf32>
    %c0_7 = arith.constant 0 : index
    %c0_8 = arith.constant 0 : index
    %4 = vector.load %arg10[%c0_7, %c0_8] : memref<1x8xf32, #tpu.memory_space<vmem>>, vector<1x8xf32>
    %c0_9 = arith.constant 0 : index
    %c0_10 = arith.constant 0 : index
    %5 = vector.load %arg0[%c0_9, %c0_10] : memref<16x7xf32, #tpu.memory_space<vmem>>, vector<16x7xf32>
    %c0_11 = arith.constant 0 : index
    %c0_12 = arith.constant 0 : index
    %6 = vector.load %arg3[%c0_11, %c0_12] : memref<7x24xf32, #tpu.memory_space<vmem>>, vector<7x24xf32>
    %cst = arith.constant dense<0.000000e+00> : vector<16x24xf32>
    %7 = tpu.matmul %5, %6, %cst {dimension_numbers = #tpu.dot_dimension_numbers<[1], [0], [0], [1], [0, 0, 1, 1], [], []>} : vector<16x7xf32>, vector<7x24xf32>, vector<16x24xf32> -> vector<16x24xf32>
    %c0_13 = arith.constant 0 : index
    %c0_14 = arith.constant 0 : index
    %8 = vector.load %arg4[%c0_13, %c0_14] : memref<1x24xf32, #tpu.memory_space<vmem>>, vector<1x24xf32>
    %9 = vector.broadcast %8 : vector<1x24xf32> to vector<16x24xf32>
    %10 = arith.addf %7, %9 : vector<16x24xf32>
    %c0_15 = arith.constant 0 : index
    %c0_16 = arith.constant 0 : index
    %11 = vector.load %arg1[%c0_15, %c0_16] : memref<10x6xf32, #tpu.memory_space<vmem>>, vector<10x6xf32>
    %c0_17 = arith.constant 0 : index
    %c0_18 = arith.constant 0 : index
    %12 = vector.load %arg7[%c0_17, %c0_18] : memref<6x24xf32, #tpu.memory_space<vmem>>, vector<6x24xf32>
    %cst_19 = arith.constant dense<0.000000e+00> : vector<10x24xf32>
    %13 = tpu.matmul %11, %12, %cst_19 {dimension_numbers = #tpu.dot_dimension_numbers<[1], [0], [0], [1], [0, 0, 1, 1], [], []>} : vector<10x6xf32>, vector<6x24xf32>, vector<10x24xf32> -> vector<10x24xf32>
    %c0_20 = arith.constant 0 : index
    %c0_21 = arith.constant 0 : index
    %14 = vector.load %arg8[%c0_20, %c0_21] : memref<1x24xf32, #tpu.memory_space<vmem>>, vector<1x24xf32>
    %15 = vector.broadcast %14 : vector<1x24xf32> to vector<10x24xf32>
    %16 = arith.addf %13, %15 : vector<10x24xf32>
    %17 = vector.extract_strided_slice %10 {offsets = [0, 0], sizes = [2, 24], strides = [1, 1]} : vector<16x24xf32> to vector<2x24xf32>
    %cst_22 = arith.constant dense<0.000000e+00> : vector<2x24xf32>
    %18 = tpu.matmul %0, %1, %cst_22 {dimension_numbers = #tpu.dot_dimension_numbers<[1], [0], [0], [1], [0, 0, 1, 1], [], []>} : vector<2x8xf32>, vector<8x24xf32>, vector<2x24xf32> -> vector<2x24xf32>
    %19 = vector.extract_strided_slice %17 {offsets = [0, 0], sizes = [2, 16], strides = [1, 1]} : vector<2x24xf32> to vector<2x16xf32>
    %20 = vector.extract_strided_slice %18 {offsets = [0, 0], sizes = [2, 16], strides = [1, 1]} : vector<2x24xf32> to vector<2x16xf32>
    %21 = arith.addf %19, %20 : vector<2x16xf32>
    %22 = arith.negf %21 : vector<2x16xf32>
    %23 = math.exp %22 : vector<2x16xf32>
    %cst_23 = arith.constant 1.000000e+00 : f32
    %24 = vector.broadcast %cst_23 : f32 to vector<2x16xf32>
    %25 = arith.addf %24, %23 : vector<2x16xf32>
    %26 = arith.divf %24, %25 : vector<2x16xf32>
    %27 = vector.extract_strided_slice %26 {offsets = [0, 0], sizes = [2, 8], strides = [1, 1]} : vector<2x16xf32> to vector<2x8xf32>
    %28 = vector.extract_strided_slice %26 {offsets = [0, 8], sizes = [2, 8], strides = [1, 1]} : vector<2x16xf32> to vector<2x8xf32>
    %29 = vector.extract_strided_slice %17 {offsets = [0, 16], sizes = [2, 8], strides = [1, 1]} : vector<2x24xf32> to vector<2x8xf32>
    %30 = vector.extract_strided_slice %18 {offsets = [0, 16], sizes = [2, 8], strides = [1, 1]} : vector<2x24xf32> to vector<2x8xf32>
    %31 = vector.broadcast %2 : vector<1x8xf32> to vector<2x8xf32>
    %32 = arith.addf %30, %31 : vector<2x8xf32>
    %33 = arith.mulf %27, %32 : vector<2x8xf32>
    %34 = arith.addf %29, %33 : vector<2x8xf32>
    %35 = math.tanh %34 : vector<2x8xf32>
    %cst_24 = arith.constant 1.000000e+00 : f32
    %36 = vector.broadcast %cst_24 : f32 to vector<2x8xf32>
    %37 = arith.subf %36, %28 : vector<2x8xf32>
    %38 = arith.mulf %37, %35 : vector<2x8xf32>
    %39 = arith.mulf %28, %0 : vector<2x8xf32>
    %40 = arith.addf %38, %39 : vector<2x8xf32>
    %41 = vector.extract_strided_slice %10 {offsets = [2, 0], sizes = [2, 24], strides = [1, 1]} : vector<16x24xf32> to vector<2x24xf32>
    %cst_25 = arith.constant dense<0.000000e+00> : vector<2x24xf32>
    %42 = tpu.matmul %40, %1, %cst_25 {dimension_numbers = #tpu.dot_dimension_numbers<[1], [0], [0], [1], [0, 0, 1, 1], [], []>} : vector<2x8xf32>, vector<8x24xf32>, vector<2x24xf32> -> vector<2x24xf32>
    %43 = vector.extract_strided_slice %41 {offsets = [0, 0], sizes = [2, 16], strides = [1, 1]} : vector<2x24xf32> to vector<2x16xf32>
    %44 = vector.extract_strided_slice %42 {offsets = [0, 0], sizes = [2, 16], strides = [1, 1]} : vector<2x24xf32> to vector<2x16xf32>
    %45 = arith.addf %43, %44 : vector<2x16xf32>
    %46 = arith.negf %45 : vector<2x16xf32>
    %47 = math.exp %46 : vector<2x16xf32>
    %cst_26 = arith.constant 1.000000e+00 : f32
    %48 = vector.broadcast %cst_26 : f32 to vector<2x16xf32>
    %49 = arith.addf %48, %47 : vector<2x16xf32>
    %50 = arith.divf %48, %49 : vector<2x16xf32>
    %51 = vector.extract_strided_slice %50 {offsets = [0, 0], sizes = [2, 8], strides = [1, 1]} : vector<2x16xf32> to vector<2x8xf32>
    %52 = vector.extract_strided_slice %50 {offsets = [0, 8], sizes = [2, 8], strides = [1, 1]} : vector<2x16xf32> to vector<2x8xf32>
    %53 = vector.extract_strided_slice %41 {offsets = [0, 16], sizes = [2, 8], strides = [1, 1]} : vector<2x24xf32> to vector<2x8xf32>
    %54 = vector.extract_strided_slice %42 {offsets = [0, 16], sizes = [2, 8], strides = [1, 1]} : vector<2x24xf32> to vector<2x8xf32>
    %55 = vector.broadcast %2 : vector<1x8xf32> to vector<2x8xf32>
    %56 = arith.addf %54, %55 : vector<2x8xf32>
    %57 = arith.mulf %51, %56 : vector<2x8xf32>
    %58 = arith.addf %53, %57 : vector<2x8xf32>
    %59 = math.tanh %58 : vector<2x8xf32>
    %cst_27 = arith.constant 1.000000e+00 : f32
    %60 = vector.broadcast %cst_27 : f32 to vector<2x8xf32>
    %61 = arith.subf %60, %52 : vector<2x8xf32>
    %62 = arith.mulf %61, %59 : vector<2x8xf32>
    %63 = arith.mulf %52, %40 : vector<2x8xf32>
    %64 = arith.addf %62, %63 : vector<2x8xf32>
    %65 = vector.extract_strided_slice %10 {offsets = [4, 0], sizes = [2, 24], strides = [1, 1]} : vector<16x24xf32> to vector<2x24xf32>
    %cst_28 = arith.constant dense<0.000000e+00> : vector<2x24xf32>
    %66 = tpu.matmul %64, %1, %cst_28 {dimension_numbers = #tpu.dot_dimension_numbers<[1], [0], [0], [1], [0, 0, 1, 1], [], []>} : vector<2x8xf32>, vector<8x24xf32>, vector<2x24xf32> -> vector<2x24xf32>
    %67 = vector.extract_strided_slice %65 {offsets = [0, 0], sizes = [2, 16], strides = [1, 1]} : vector<2x24xf32> to vector<2x16xf32>
    %68 = vector.extract_strided_slice %66 {offsets = [0, 0], sizes = [2, 16], strides = [1, 1]} : vector<2x24xf32> to vector<2x16xf32>
    %69 = arith.addf %67, %68 : vector<2x16xf32>
    %70 = arith.negf %69 : vector<2x16xf32>
    %71 = math.exp %70 : vector<2x16xf32>
    %cst_29 = arith.constant 1.000000e+00 : f32
    %72 = vector.broadcast %cst_29 : f32 to vector<2x16xf32>
    %73 = arith.addf %72, %71 : vector<2x16xf32>
    %74 = arith.divf %72, %73 : vector<2x16xf32>
    %75 = vector.extract_strided_slice %74 {offsets = [0, 0], sizes = [2, 8], strides = [1, 1]} : vector<2x16xf32> to vector<2x8xf32>
    %76 = vector.extract_strided_slice %74 {offsets = [0, 8], sizes = [2, 8], strides = [1, 1]} : vector<2x16xf32> to vector<2x8xf32>
    %77 = vector.extract_strided_slice %65 {offsets = [0, 16], sizes = [2, 8], strides = [1, 1]} : vector<2x24xf32> to vector<2x8xf32>
    %78 = vector.extract_strided_slice %66 {offsets = [0, 16], sizes = [2, 8], strides = [1, 1]} : vector<2x24xf32> to vector<2x8xf32>
    %79 = vector.broadcast %2 : vector<1x8xf32> to vector<2x8xf32>
    %80 = arith.addf %78, %79 : vector<2x8xf32>
    %81 = arith.mulf %75, %80 : vector<2x8xf32>
    %82 = arith.addf %77, %81 : vector<2x8xf32>
    %83 = math.tanh %82 : vector<2x8xf32>
    %cst_30 = arith.constant 1.000000e+00 : f32
    %84 = vector.broadcast %cst_30 : f32 to vector<2x8xf32>
    %85 = arith.subf %84, %76 : vector<2x8xf32>
    %86 = arith.mulf %85, %83 : vector<2x8xf32>
    %87 = arith.mulf %76, %64 : vector<2x8xf32>
    %88 = arith.addf %86, %87 : vector<2x8xf32>
    %89 = vector.extract_strided_slice %10 {offsets = [6, 0], sizes = [2, 24], strides = [1, 1]} : vector<16x24xf32> to vector<2x24xf32>
    %cst_31 = arith.constant dense<0.000000e+00> : vector<2x24xf32>
    %90 = tpu.matmul %88, %1, %cst_31 {dimension_numbers = #tpu.dot_dimension_numbers<[1], [0], [0], [1], [0, 0, 1, 1], [], []>} : vector<2x8xf32>, vector<8x24xf32>, vector<2x24xf32> -> vector<2x24xf32>
    %91 = vector.extract_strided_slice %89 {offsets = [0, 0], sizes = [2, 16], strides = [1, 1]} : vector<2x24xf32> to vector<2x16xf32>
    %92 = vector.extract_strided_slice %90 {offsets = [0, 0], sizes = [2, 16], strides = [1, 1]} : vector<2x24xf32> to vector<2x16xf32>
    %93 = arith.addf %91, %92 : vector<2x16xf32>
    %94 = arith.negf %93 : vector<2x16xf32>
    %95 = math.exp %94 : vector<2x16xf32>
    %cst_32 = arith.constant 1.000000e+00 : f32
    %96 = vector.broadcast %cst_32 : f32 to vector<2x16xf32>
    %97 = arith.addf %96, %95 : vector<2x16xf32>
    %98 = arith.divf %96, %97 : vector<2x16xf32>
    %99 = vector.extract_strided_slice %98 {offsets = [0, 0], sizes = [2, 8], strides = [1, 1]} : vector<2x16xf32> to vector<2x8xf32>
    %100 = vector.extract_strided_slice %98 {offsets = [0, 8], sizes = [2, 8], strides = [1, 1]} : vector<2x16xf32> to vector<2x8xf32>
    %101 = vector.extract_strided_slice %89 {offsets = [0, 16], sizes = [2, 8], strides = [1, 1]} : vector<2x24xf32> to vector<2x8xf32>
    %102 = vector.extract_strided_slice %90 {offsets = [0, 16], sizes = [2, 8], strides = [1, 1]} : vector<2x24xf32> to vector<2x8xf32>
    %103 = vector.broadcast %2 : vector<1x8xf32> to vector<2x8xf32>
    %104 = arith.addf %102, %103 : vector<2x8xf32>
    %105 = arith.mulf %99, %104 : vector<2x8xf32>
    %106 = arith.addf %101, %105 : vector<2x8xf32>
    %107 = math.tanh %106 : vector<2x8xf32>
    %cst_33 = arith.constant 1.000000e+00 : f32
    %108 = vector.broadcast %cst_33 : f32 to vector<2x8xf32>
    %109 = arith.subf %108, %100 : vector<2x8xf32>
    %110 = arith.mulf %109, %107 : vector<2x8xf32>
    %111 = arith.mulf %100, %88 : vector<2x8xf32>
    %112 = arith.addf %110, %111 : vector<2x8xf32>
    %113 = vector.extract_strided_slice %10 {offsets = [8, 0], sizes = [2, 24], strides = [1, 1]} : vector<16x24xf32> to vector<2x24xf32>
    %cst_34 = arith.constant dense<0.000000e+00> : vector<2x24xf32>
    %114 = tpu.matmul %112, %1, %cst_34 {dimension_numbers = #tpu.dot_dimension_numbers<[1], [0], [0], [1], [0, 0, 1, 1], [], []>} : vector<2x8xf32>, vector<8x24xf32>, vector<2x24xf32> -> vector<2x24xf32>
    %115 = vector.extract_strided_slice %113 {offsets = [0, 0], sizes = [2, 16], strides = [1, 1]} : vector<2x24xf32> to vector<2x16xf32>
    %116 = vector.extract_strided_slice %114 {offsets = [0, 0], sizes = [2, 16], strides = [1, 1]} : vector<2x24xf32> to vector<2x16xf32>
    %117 = arith.addf %115, %116 : vector<2x16xf32>
    %118 = arith.negf %117 : vector<2x16xf32>
    %119 = math.exp %118 : vector<2x16xf32>
    %cst_35 = arith.constant 1.000000e+00 : f32
    %120 = vector.broadcast %cst_35 : f32 to vector<2x16xf32>
    %121 = arith.addf %120, %119 : vector<2x16xf32>
    %122 = arith.divf %120, %121 : vector<2x16xf32>
    %123 = vector.extract_strided_slice %122 {offsets = [0, 0], sizes = [2, 8], strides = [1, 1]} : vector<2x16xf32> to vector<2x8xf32>
    %124 = vector.extract_strided_slice %122 {offsets = [0, 8], sizes = [2, 8], strides = [1, 1]} : vector<2x16xf32> to vector<2x8xf32>
    %125 = vector.extract_strided_slice %113 {offsets = [0, 16], sizes = [2, 8], strides = [1, 1]} : vector<2x24xf32> to vector<2x8xf32>
    %126 = vector.extract_strided_slice %114 {offsets = [0, 16], sizes = [2, 8], strides = [1, 1]} : vector<2x24xf32> to vector<2x8xf32>
    %127 = vector.broadcast %2 : vector<1x8xf32> to vector<2x8xf32>
    %128 = arith.addf %126, %127 : vector<2x8xf32>
    %129 = arith.mulf %123, %128 : vector<2x8xf32>
    %130 = arith.addf %125, %129 : vector<2x8xf32>
    %131 = math.tanh %130 : vector<2x8xf32>
    %cst_36 = arith.constant 1.000000e+00 : f32
    %132 = vector.broadcast %cst_36 : f32 to vector<2x8xf32>
    %133 = arith.subf %132, %124 : vector<2x8xf32>
    %134 = arith.mulf %133, %131 : vector<2x8xf32>
    %135 = arith.mulf %124, %112 : vector<2x8xf32>
    %136 = arith.addf %134, %135 : vector<2x8xf32>
    %137 = vector.extract_strided_slice %10 {offsets = [10, 0], sizes = [2, 24], strides = [1, 1]} : vector<16x24xf32> to vector<2x24xf32>
    %cst_37 = arith.constant dense<0.000000e+00> : vector<2x24xf32>
    %138 = tpu.matmul %136, %1, %cst_37 {dimension_numbers = #tpu.dot_dimension_numbers<[1], [0], [0], [1], [0, 0, 1, 1], [], []>} : vector<2x8xf32>, vector<8x24xf32>, vector<2x24xf32> -> vector<2x24xf32>
    %139 = vector.extract_strided_slice %137 {offsets = [0, 0], sizes = [2, 16], strides = [1, 1]} : vector<2x24xf32> to vector<2x16xf32>
    %140 = vector.extract_strided_slice %138 {offsets = [0, 0], sizes = [2, 16], strides = [1, 1]} : vector<2x24xf32> to vector<2x16xf32>
    %141 = arith.addf %139, %140 : vector<2x16xf32>
    %142 = arith.negf %141 : vector<2x16xf32>
    %143 = math.exp %142 : vector<2x16xf32>
    %cst_38 = arith.constant 1.000000e+00 : f32
    %144 = vector.broadcast %cst_38 : f32 to vector<2x16xf32>
    %145 = arith.addf %144, %143 : vector<2x16xf32>
    %146 = arith.divf %144, %145 : vector<2x16xf32>
    %147 = vector.extract_strided_slice %146 {offsets = [0, 0], sizes = [2, 8], strides = [1, 1]} : vector<2x16xf32> to vector<2x8xf32>
    %148 = vector.extract_strided_slice %146 {offsets = [0, 8], sizes = [2, 8], strides = [1, 1]} : vector<2x16xf32> to vector<2x8xf32>
    %149 = vector.extract_strided_slice %137 {offsets = [0, 16], sizes = [2, 8], strides = [1, 1]} : vector<2x24xf32> to vector<2x8xf32>
    %150 = vector.extract_strided_slice %138 {offsets = [0, 16], sizes = [2, 8], strides = [1, 1]} : vector<2x24xf32> to vector<2x8xf32>
    %151 = vector.broadcast %2 : vector<1x8xf32> to vector<2x8xf32>
    %152 = arith.addf %150, %151 : vector<2x8xf32>
    %153 = arith.mulf %147, %152 : vector<2x8xf32>
    %154 = arith.addf %149, %153 : vector<2x8xf32>
    %155 = math.tanh %154 : vector<2x8xf32>
    %cst_39 = arith.constant 1.000000e+00 : f32
    %156 = vector.broadcast %cst_39 : f32 to vector<2x8xf32>
    %157 = arith.subf %156, %148 : vector<2x8xf32>
    %158 = arith.mulf %157, %155 : vector<2x8xf32>
    %159 = arith.mulf %148, %136 : vector<2x8xf32>
    %160 = arith.addf %158, %159 : vector<2x8xf32>
    %161 = vector.extract_strided_slice %10 {offsets = [12, 0], sizes = [2, 24], strides = [1, 1]} : vector<16x24xf32> to vector<2x24xf32>
    %cst_40 = arith.constant dense<0.000000e+00> : vector<2x24xf32>
    %162 = tpu.matmul %160, %1, %cst_40 {dimension_numbers = #tpu.dot_dimension_numbers<[1], [0], [0], [1], [0, 0, 1, 1], [], []>} : vector<2x8xf32>, vector<8x24xf32>, vector<2x24xf32> -> vector<2x24xf32>
    %163 = vector.extract_strided_slice %161 {offsets = [0, 0], sizes = [2, 16], strides = [1, 1]} : vector<2x24xf32> to vector<2x16xf32>
    %164 = vector.extract_strided_slice %162 {offsets = [0, 0], sizes = [2, 16], strides = [1, 1]} : vector<2x24xf32> to vector<2x16xf32>
    %165 = arith.addf %163, %164 : vector<2x16xf32>
    %166 = arith.negf %165 : vector<2x16xf32>
    %167 = math.exp %166 : vector<2x16xf32>
    %cst_41 = arith.constant 1.000000e+00 : f32
    %168 = vector.broadcast %cst_41 : f32 to vector<2x16xf32>
    %169 = arith.addf %168, %167 : vector<2x16xf32>
    %170 = arith.divf %168, %169 : vector<2x16xf32>
    %171 = vector.extract_strided_slice %170 {offsets = [0, 0], sizes = [2, 8], strides = [1, 1]} : vector<2x16xf32> to vector<2x8xf32>
    %172 = vector.extract_strided_slice %170 {offsets = [0, 8], sizes = [2, 8], strides = [1, 1]} : vector<2x16xf32> to vector<2x8xf32>
    %173 = vector.extract_strided_slice %161 {offsets = [0, 16], sizes = [2, 8], strides = [1, 1]} : vector<2x24xf32> to vector<2x8xf32>
    %174 = vector.extract_strided_slice %162 {offsets = [0, 16], sizes = [2, 8], strides = [1, 1]} : vector<2x24xf32> to vector<2x8xf32>
    %175 = vector.broadcast %2 : vector<1x8xf32> to vector<2x8xf32>
    %176 = arith.addf %174, %175 : vector<2x8xf32>
    %177 = arith.mulf %171, %176 : vector<2x8xf32>
    %178 = arith.addf %173, %177 : vector<2x8xf32>
    %179 = math.tanh %178 : vector<2x8xf32>
    %cst_42 = arith.constant 1.000000e+00 : f32
    %180 = vector.broadcast %cst_42 : f32 to vector<2x8xf32>
    %181 = arith.subf %180, %172 : vector<2x8xf32>
    %182 = arith.mulf %181, %179 : vector<2x8xf32>
    %183 = arith.mulf %172, %160 : vector<2x8xf32>
    %184 = arith.addf %182, %183 : vector<2x8xf32>
    %185 = vector.extract_strided_slice %10 {offsets = [14, 0], sizes = [2, 24], strides = [1, 1]} : vector<16x24xf32> to vector<2x24xf32>
    %cst_43 = arith.constant dense<0.000000e+00> : vector<2x24xf32>
    %186 = tpu.matmul %184, %1, %cst_43 {dimension_numbers = #tpu.dot_dimension_numbers<[1], [0], [0], [1], [0, 0, 1, 1], [], []>} : vector<2x8xf32>, vector<8x24xf32>, vector<2x24xf32> -> vector<2x24xf32>
    %187 = vector.extract_strided_slice %185 {offsets = [0, 0], sizes = [2, 16], strides = [1, 1]} : vector<2x24xf32> to vector<2x16xf32>
    %188 = vector.extract_strided_slice %186 {offsets = [0, 0], sizes = [2, 16], strides = [1, 1]} : vector<2x24xf32> to vector<2x16xf32>
    %189 = arith.addf %187, %188 : vector<2x16xf32>
    %190 = arith.negf %189 : vector<2x16xf32>
    %191 = math.exp %190 : vector<2x16xf32>
    %cst_44 = arith.constant 1.000000e+00 : f32
    %192 = vector.broadcast %cst_44 : f32 to vector<2x16xf32>
    %193 = arith.addf %192, %191 : vector<2x16xf32>
    %194 = arith.divf %192, %193 : vector<2x16xf32>
    %195 = vector.extract_strided_slice %194 {offsets = [0, 0], sizes = [2, 8], strides = [1, 1]} : vector<2x16xf32> to vector<2x8xf32>
    %196 = vector.extract_strided_slice %194 {offsets = [0, 8], sizes = [2, 8], strides = [1, 1]} : vector<2x16xf32> to vector<2x8xf32>
    %197 = vector.extract_strided_slice %185 {offsets = [0, 16], sizes = [2, 8], strides = [1, 1]} : vector<2x24xf32> to vector<2x8xf32>
    %198 = vector.extract_strided_slice %186 {offsets = [0, 16], sizes = [2, 8], strides = [1, 1]} : vector<2x24xf32> to vector<2x8xf32>
    %199 = vector.broadcast %2 : vector<1x8xf32> to vector<2x8xf32>
    %200 = arith.addf %198, %199 : vector<2x8xf32>
    %201 = arith.mulf %195, %200 : vector<2x8xf32>
    %202 = arith.addf %197, %201 : vector<2x8xf32>
    %203 = math.tanh %202 : vector<2x8xf32>
    %cst_45 = arith.constant 1.000000e+00 : f32
    %204 = vector.broadcast %cst_45 : f32 to vector<2x8xf32>
    %205 = arith.subf %204, %196 : vector<2x8xf32>
    %206 = arith.mulf %205, %203 : vector<2x8xf32>
    %207 = arith.mulf %196, %184 : vector<2x8xf32>
    %208 = arith.addf %206, %207 : vector<2x8xf32>
    %209 = vector.extract_strided_slice %16 {offsets = [0, 0], sizes = [2, 24], strides = [1, 1]} : vector<10x24xf32> to vector<2x24xf32>
    %cst_46 = arith.constant dense<0.000000e+00> : vector<2x24xf32>
    %210 = tpu.matmul %208, %3, %cst_46 {dimension_numbers = #tpu.dot_dimension_numbers<[1], [0], [0], [1], [0, 0, 1, 1], [], []>} : vector<2x8xf32>, vector<8x24xf32>, vector<2x24xf32> -> vector<2x24xf32>
    %211 = vector.extract_strided_slice %209 {offsets = [0, 0], sizes = [2, 16], strides = [1, 1]} : vector<2x24xf32> to vector<2x16xf32>
    %212 = vector.extract_strided_slice %210 {offsets = [0, 0], sizes = [2, 16], strides = [1, 1]} : vector<2x24xf32> to vector<2x16xf32>
    %213 = arith.addf %211, %212 : vector<2x16xf32>
    %214 = arith.negf %213 : vector<2x16xf32>
    %215 = math.exp %214 : vector<2x16xf32>
    %cst_47 = arith.constant 1.000000e+00 : f32
    %216 = vector.broadcast %cst_47 : f32 to vector<2x16xf32>
    %217 = arith.addf %216, %215 : vector<2x16xf32>
    %218 = arith.divf %216, %217 : vector<2x16xf32>
    %219 = vector.extract_strided_slice %218 {offsets = [0, 0], sizes = [2, 8], strides = [1, 1]} : vector<2x16xf32> to vector<2x8xf32>
    %220 = vector.extract_strided_slice %218 {offsets = [0, 8], sizes = [2, 8], strides = [1, 1]} : vector<2x16xf32> to vector<2x8xf32>
    %221 = vector.extract_strided_slice %209 {offsets = [0, 16], sizes = [2, 8], strides = [1, 1]} : vector<2x24xf32> to vector<2x8xf32>
    %222 = vector.extract_strided_slice %210 {offsets = [0, 16], sizes = [2, 8], strides = [1, 1]} : vector<2x24xf32> to vector<2x8xf32>
    %223 = vector.broadcast %4 : vector<1x8xf32> to vector<2x8xf32>
    %224 = arith.addf %222, %223 : vector<2x8xf32>
    %225 = arith.mulf %219, %224 : vector<2x8xf32>
    %226 = arith.addf %221, %225 : vector<2x8xf32>
    %227 = math.tanh %226 : vector<2x8xf32>
    %cst_48 = arith.constant 1.000000e+00 : f32
    %228 = vector.broadcast %cst_48 : f32 to vector<2x8xf32>
    %229 = arith.subf %228, %220 : vector<2x8xf32>
    %230 = arith.mulf %229, %227 : vector<2x8xf32>
    %231 = arith.mulf %220, %208 : vector<2x8xf32>
    %232 = arith.addf %230, %231 : vector<2x8xf32>
    %233 = vector.extract_strided_slice %16 {offsets = [2, 0], sizes = [2, 24], strides = [1, 1]} : vector<10x24xf32> to vector<2x24xf32>
    %cst_49 = arith.constant dense<0.000000e+00> : vector<2x24xf32>
    %234 = tpu.matmul %232, %3, %cst_49 {dimension_numbers = #tpu.dot_dimension_numbers<[1], [0], [0], [1], [0, 0, 1, 1], [], []>} : vector<2x8xf32>, vector<8x24xf32>, vector<2x24xf32> -> vector<2x24xf32>
    %235 = vector.extract_strided_slice %233 {offsets = [0, 0], sizes = [2, 16], strides = [1, 1]} : vector<2x24xf32> to vector<2x16xf32>
    %236 = vector.extract_strided_slice %234 {offsets = [0, 0], sizes = [2, 16], strides = [1, 1]} : vector<2x24xf32> to vector<2x16xf32>
    %237 = arith.addf %235, %236 : vector<2x16xf32>
    %238 = arith.negf %237 : vector<2x16xf32>
    %239 = math.exp %238 : vector<2x16xf32>
    %cst_50 = arith.constant 1.000000e+00 : f32
    %240 = vector.broadcast %cst_50 : f32 to vector<2x16xf32>
    %241 = arith.addf %240, %239 : vector<2x16xf32>
    %242 = arith.divf %240, %241 : vector<2x16xf32>
    %243 = vector.extract_strided_slice %242 {offsets = [0, 0], sizes = [2, 8], strides = [1, 1]} : vector<2x16xf32> to vector<2x8xf32>
    %244 = vector.extract_strided_slice %242 {offsets = [0, 8], sizes = [2, 8], strides = [1, 1]} : vector<2x16xf32> to vector<2x8xf32>
    %245 = vector.extract_strided_slice %233 {offsets = [0, 16], sizes = [2, 8], strides = [1, 1]} : vector<2x24xf32> to vector<2x8xf32>
    %246 = vector.extract_strided_slice %234 {offsets = [0, 16], sizes = [2, 8], strides = [1, 1]} : vector<2x24xf32> to vector<2x8xf32>
    %247 = vector.broadcast %4 : vector<1x8xf32> to vector<2x8xf32>
    %248 = arith.addf %246, %247 : vector<2x8xf32>
    %249 = arith.mulf %243, %248 : vector<2x8xf32>
    %250 = arith.addf %245, %249 : vector<2x8xf32>
    %251 = math.tanh %250 : vector<2x8xf32>
    %cst_51 = arith.constant 1.000000e+00 : f32
    %252 = vector.broadcast %cst_51 : f32 to vector<2x8xf32>
    %253 = arith.subf %252, %244 : vector<2x8xf32>
    %254 = arith.mulf %253, %251 : vector<2x8xf32>
    %255 = arith.mulf %244, %232 : vector<2x8xf32>
    %256 = arith.addf %254, %255 : vector<2x8xf32>
    %257 = vector.extract_strided_slice %16 {offsets = [4, 0], sizes = [2, 24], strides = [1, 1]} : vector<10x24xf32> to vector<2x24xf32>
    %cst_52 = arith.constant dense<0.000000e+00> : vector<2x24xf32>
    %258 = tpu.matmul %256, %3, %cst_52 {dimension_numbers = #tpu.dot_dimension_numbers<[1], [0], [0], [1], [0, 0, 1, 1], [], []>} : vector<2x8xf32>, vector<8x24xf32>, vector<2x24xf32> -> vector<2x24xf32>
    %259 = vector.extract_strided_slice %257 {offsets = [0, 0], sizes = [2, 16], strides = [1, 1]} : vector<2x24xf32> to vector<2x16xf32>
    %260 = vector.extract_strided_slice %258 {offsets = [0, 0], sizes = [2, 16], strides = [1, 1]} : vector<2x24xf32> to vector<2x16xf32>
    %261 = arith.addf %259, %260 : vector<2x16xf32>
    %262 = arith.negf %261 : vector<2x16xf32>
    %263 = math.exp %262 : vector<2x16xf32>
    %cst_53 = arith.constant 1.000000e+00 : f32
    %264 = vector.broadcast %cst_53 : f32 to vector<2x16xf32>
    %265 = arith.addf %264, %263 : vector<2x16xf32>
    %266 = arith.divf %264, %265 : vector<2x16xf32>
    %267 = vector.extract_strided_slice %266 {offsets = [0, 0], sizes = [2, 8], strides = [1, 1]} : vector<2x16xf32> to vector<2x8xf32>
    %268 = vector.extract_strided_slice %266 {offsets = [0, 8], sizes = [2, 8], strides = [1, 1]} : vector<2x16xf32> to vector<2x8xf32>
    %269 = vector.extract_strided_slice %257 {offsets = [0, 16], sizes = [2, 8], strides = [1, 1]} : vector<2x24xf32> to vector<2x8xf32>
    %270 = vector.extract_strided_slice %258 {offsets = [0, 16], sizes = [2, 8], strides = [1, 1]} : vector<2x24xf32> to vector<2x8xf32>
    %271 = vector.broadcast %4 : vector<1x8xf32> to vector<2x8xf32>
    %272 = arith.addf %270, %271 : vector<2x8xf32>
    %273 = arith.mulf %267, %272 : vector<2x8xf32>
    %274 = arith.addf %269, %273 : vector<2x8xf32>
    %275 = math.tanh %274 : vector<2x8xf32>
    %cst_54 = arith.constant 1.000000e+00 : f32
    %276 = vector.broadcast %cst_54 : f32 to vector<2x8xf32>
    %277 = arith.subf %276, %268 : vector<2x8xf32>
    %278 = arith.mulf %277, %275 : vector<2x8xf32>
    %279 = arith.mulf %268, %256 : vector<2x8xf32>
    %280 = arith.addf %278, %279 : vector<2x8xf32>
    %281 = vector.extract_strided_slice %16 {offsets = [6, 0], sizes = [2, 24], strides = [1, 1]} : vector<10x24xf32> to vector<2x24xf32>
    %cst_55 = arith.constant dense<0.000000e+00> : vector<2x24xf32>
    %282 = tpu.matmul %280, %3, %cst_55 {dimension_numbers = #tpu.dot_dimension_numbers<[1], [0], [0], [1], [0, 0, 1, 1], [], []>} : vector<2x8xf32>, vector<8x24xf32>, vector<2x24xf32> -> vector<2x24xf32>
    %283 = vector.extract_strided_slice %281 {offsets = [0, 0], sizes = [2, 16], strides = [1, 1]} : vector<2x24xf32> to vector<2x16xf32>
    %284 = vector.extract_strided_slice %282 {offsets = [0, 0], sizes = [2, 16], strides = [1, 1]} : vector<2x24xf32> to vector<2x16xf32>
    %285 = arith.addf %283, %284 : vector<2x16xf32>
    %286 = arith.negf %285 : vector<2x16xf32>
    %287 = math.exp %286 : vector<2x16xf32>
    %cst_56 = arith.constant 1.000000e+00 : f32
    %288 = vector.broadcast %cst_56 : f32 to vector<2x16xf32>
    %289 = arith.addf %288, %287 : vector<2x16xf32>
    %290 = arith.divf %288, %289 : vector<2x16xf32>
    %291 = vector.extract_strided_slice %290 {offsets = [0, 0], sizes = [2, 8], strides = [1, 1]} : vector<2x16xf32> to vector<2x8xf32>
    %292 = vector.extract_strided_slice %290 {offsets = [0, 8], sizes = [2, 8], strides = [1, 1]} : vector<2x16xf32> to vector<2x8xf32>
    %293 = vector.extract_strided_slice %281 {offsets = [0, 16], sizes = [2, 8], strides = [1, 1]} : vector<2x24xf32> to vector<2x8xf32>
    %294 = vector.extract_strided_slice %282 {offsets = [0, 16], sizes = [2, 8], strides = [1, 1]} : vector<2x24xf32> to vector<2x8xf32>
    %295 = vector.broadcast %4 : vector<1x8xf32> to vector<2x8xf32>
    %296 = arith.addf %294, %295 : vector<2x8xf32>
    %297 = arith.mulf %291, %296 : vector<2x8xf32>
    %298 = arith.addf %293, %297 : vector<2x8xf32>
    %299 = math.tanh %298 : vector<2x8xf32>
    %cst_57 = arith.constant 1.000000e+00 : f32
    %300 = vector.broadcast %cst_57 : f32 to vector<2x8xf32>
    %301 = arith.subf %300, %292 : vector<2x8xf32>
    %302 = arith.mulf %301, %299 : vector<2x8xf32>
    %303 = arith.mulf %292, %280 : vector<2x8xf32>
    %304 = arith.addf %302, %303 : vector<2x8xf32>
    %305 = vector.extract_strided_slice %16 {offsets = [8, 0], sizes = [2, 24], strides = [1, 1]} : vector<10x24xf32> to vector<2x24xf32>
    %cst_58 = arith.constant dense<0.000000e+00> : vector<2x24xf32>
    %306 = tpu.matmul %304, %3, %cst_58 {dimension_numbers = #tpu.dot_dimension_numbers<[1], [0], [0], [1], [0, 0, 1, 1], [], []>} : vector<2x8xf32>, vector<8x24xf32>, vector<2x24xf32> -> vector<2x24xf32>
    %307 = vector.extract_strided_slice %305 {offsets = [0, 0], sizes = [2, 16], strides = [1, 1]} : vector<2x24xf32> to vector<2x16xf32>
    %308 = vector.extract_strided_slice %306 {offsets = [0, 0], sizes = [2, 16], strides = [1, 1]} : vector<2x24xf32> to vector<2x16xf32>
    %309 = arith.addf %307, %308 : vector<2x16xf32>
    %310 = arith.negf %309 : vector<2x16xf32>
    %311 = math.exp %310 : vector<2x16xf32>
    %cst_59 = arith.constant 1.000000e+00 : f32
    %312 = vector.broadcast %cst_59 : f32 to vector<2x16xf32>
    %313 = arith.addf %312, %311 : vector<2x16xf32>
    %314 = arith.divf %312, %313 : vector<2x16xf32>
    %315 = vector.extract_strided_slice %314 {offsets = [0, 0], sizes = [2, 8], strides = [1, 1]} : vector<2x16xf32> to vector<2x8xf32>
    %316 = vector.extract_strided_slice %314 {offsets = [0, 8], sizes = [2, 8], strides = [1, 1]} : vector<2x16xf32> to vector<2x8xf32>
    %317 = vector.extract_strided_slice %305 {offsets = [0, 16], sizes = [2, 8], strides = [1, 1]} : vector<2x24xf32> to vector<2x8xf32>
    %318 = vector.extract_strided_slice %306 {offsets = [0, 16], sizes = [2, 8], strides = [1, 1]} : vector<2x24xf32> to vector<2x8xf32>
    %319 = vector.broadcast %4 : vector<1x8xf32> to vector<2x8xf32>
    %320 = arith.addf %318, %319 : vector<2x8xf32>
    %321 = arith.mulf %315, %320 : vector<2x8xf32>
    %322 = arith.addf %317, %321 : vector<2x8xf32>
    %323 = math.tanh %322 : vector<2x8xf32>
    %cst_60 = arith.constant 1.000000e+00 : f32
    %324 = vector.broadcast %cst_60 : f32 to vector<2x8xf32>
    %325 = arith.subf %324, %316 : vector<2x8xf32>
    %326 = arith.mulf %325, %323 : vector<2x8xf32>
    %327 = arith.mulf %316, %304 : vector<2x8xf32>
    %328 = arith.addf %326, %327 : vector<2x8xf32>
    %329 = tpu.concatenate %232, %256, %280, %304, %328 in 0 : vector<2x8xf32>, vector<2x8xf32>, vector<2x8xf32>, vector<2x8xf32>, vector<2x8xf32> -> vector<10x8xf32>
    %cst_61 = arith.constant 0.000000e+00 : f32
    %330 = vector.broadcast %cst_61 : f32 to vector<10x8xf32>
    %331 = arith.maximumf %329, %330 : vector<10x8xf32>
    %c0_62 = arith.constant 0 : index
    %c0_63 = arith.constant 0 : index
    %332 = vector.load %arg11[%c0_62, %c0_63] : memref<8x6xf32, #tpu.memory_space<vmem>>, vector<8x6xf32>
    %cst_64 = arith.constant dense<0.000000e+00> : vector<10x6xf32>
    %333 = tpu.matmul %331, %332, %cst_64 {dimension_numbers = #tpu.dot_dimension_numbers<[1], [0], [0], [1], [0, 0, 1, 1], [], []>} : vector<10x8xf32>, vector<8x6xf32>, vector<10x6xf32> -> vector<10x6xf32>
    %c0_65 = arith.constant 0 : index
    %c0_66 = arith.constant 0 : index
    %334 = vector.load %arg12[%c0_65, %c0_66] : memref<1x6xf32, #tpu.memory_space<vmem>>, vector<1x6xf32>
    %335 = vector.broadcast %334 : vector<1x6xf32> to vector<10x6xf32>
    %336 = arith.addf %333, %335 : vector<10x6xf32>
    %c0_67 = arith.constant 0 : index
    %c0_68 = arith.constant 0 : index
    %337 = vector.load %arg13[%c0_67, %c0_68] : memref<10x6xf32, #tpu.memory_space<vmem>>, vector<10x6xf32>
    tpu.vector_store %arg13[%c0_67, %c0_68], %336 {strides = array<i32>} : memref<10x6xf32, #tpu.memory_space<vmem>>, vector<10x6xf32>,
    return
  }
}

</mosaic_0001>

<bundles_post_ra>
// kernel: wheat_gru_forward.1
= control target key start
LH: loop header
LB: loop body
LE: loop exit
PB: predicated region body
PF: predicated region fallthrough
CT: control target
= control target key end

     0   :  { %vm104_vm0 = vcmask 1045504   ;;  %vm97_vm1 = vcmask 48128   ;;  %vm63_vm2 = vcmask 1046528   ;;  %vm56_vm3 = vcmask 56320   ;;  %s1229_s20 = smov 8   ;;  %s1507_s7 = inlined_call_operand.vmem [shape: f32[6,24], index: 7, kind: input, shape index: {}]   ;;  %s1508_s1 = inlined_call_operand.vmem [shape: f32[10,6], index: 1, kind: input, shape index: {}]   ;;  %s1509_s5 = inlined_call_operand.vmem [shape: f32[8,24], index: 5, kind: input, shape index: {}]   ;;  %s1510_s3 = inlined_call_operand.vmem [shape: f32[7,24], index: 3, kind: input, shape index: {}]   ;;  %s1511_s0 = inlined_call_operand.vmem [shape: f32[16,7], index: 0, kind: input, shape index: {}]   ;;  %s1512_s6 = inlined_call_operand.vmem [shape: f32[1,8], index: 6, kind: input, shape index: {}]   ;;  %s1513_s2 = inlined_call_operand.vmem [shape: f32[2,8], index: 2, kind: input, shape index: {}]   ;;  %s1514_s8 = inlined_call_operand.vmem [shape: f32[1,24], index: 8, kind: input, shape index: {}]   ;;  %s1515_s4 = inlined_call_operand.vmem [shape: f32[1,24], index: 4, kind: input, shape index: {}]   ;;  %s1516_s9 = inlined_call_operand.vmem [shape: f32[8,24], index: 9, kind: input, shape index: {}]   ;;  %s1517_s10 = inlined_call_operand.vmem [shape: f32[1,8], index: 10, kind: input, shape index: {}]   ;;  %s1518_s11 = inlined_call_operand.vmem [shape: f32[8,6], index: 11, kind: input, shape index: {}]   ;;  %s1519_s12 = inlined_call_operand.vmem [shape: f32[1,6], index: 12, kind: input, shape index: {}]   ;;  %s1520_s13 = inlined_call_operand.vmem [shape: f32[10,6], index: 13, kind: output, shape index: {}]  }
   0x1   :  { %v92_v0 = vld [vmem:[%s1507_s7] sm:$0x3f]  ;;  %v91_v1 = vld [vmem:[%s1508_s1 + $0x8] sm:$0x3]  ;;  %vm131_vm4 = vcmask 64512  }
   0x2   :  { %v1311_v2 = vld [vmem:[%s1509_s5] sm:$0xff]  ;;  %1140 = vmatpush.msk.msra.mxu2 %vm104_vm0, %v92_v0  ;;  %1109 = vmatpush.msk.msra.mxu1 %vm104_vm0, %v92_v0 }
   0x3   :  { %v51_v3 = vld [vmem:[%s1510_s3] sm:$0x7f]  ;;  %223 = vmatpush.msra.mxu3 %v1311_v2  ;;  %1111 = vmatmul.msk.f32.vlgmr.msra.gmra.mxu2 %vm97_vm1, %v91_v1  ;;  %s1228_s3 = smov 16  }
   0x4   :  { %v49_v4 = vld [vmem:[%s1511_s0] sm:$0xff]  ;;  %1106 = vmatpush.msk.msra.mxu0 %vm63_vm2, %v51_v3  ;;  %150 = vmatpush.msrb.mxu2 %v1311_v2 }
   0x5   :  { %v1145_v5 = vld [vmem:[%s1512_s6] ss:$0 sm:$0xff]  ;;  %1107 = vmatmul.msk.f32.vlgmr.msra.gmra.mxu0 %vm56_vm3, %v49_v4  ;;  %367 = vmatpush.msrb.mxu3 %v1311_v2 }
   0x6   :  { %v44_v6 = vld [vmem:[%s1513_s2] sm:$0x3]  ;;  %177 = vrot.lane.b32.xlu0 %v1145_v5, %s1228_s3  ;;  %295 = vmatpush.msra.mxu2 %v1311_v2  ;;  %s1230_s2 = smov 112  }
   0x7   :  { %198 = vrot.lane.b32.xlu2 %v44_v6, %s1229_s20  ;;  %439 = vmatpush.msrb.mxu0 %v1311_v2  ;;  %v1347_v11 = vld [vmem:[%s1515_s4] ss:$0 sm:$0xff]  ;;  %s1231_s4 = smov 120  }
   0x8   :  { %505 = vmatpush.msrb.mxu1 %v1311_v2 }
   0xb   :  { %1112 = vmatmul.msk.f32.vlgmr.msrb.gmra.mxu2 %vm131_vm4, %v44_v6 }
   0xc   :  { %577 = vmatpush.msrb.mxu2 %v1311_v2 }
  0x61   :  { %v199_v33 = vpop.permute.xlu2 %198 }
  0x78   :  { %v1340_v8 = vpop.permute.xlu0 %177 }
  0x82   :  { %v84_v12 = vpop.f32.mrf.mxu0 }
  0x83   :  { %v1350_v13 = vadd.f32 %v1347_v11, %v84_v12 }
  0x86   :  { %v1338_v7 = vpop.f32.mrf.mxu2 }
  0x8e   :  { %v152_v9 = vpop.f32.mrf.mxu2 }
  0x8f   :  { %v180_v10 = vadd.f32 %v1340_v8, %v152_v9  ;;  %v155_v14 = vadd.f32 %v152_v9, %v1350_v13 }
  0x91   :  { %182 = vrot.lane.b32.xlu0 %v180_v10, %s1230_s2  ;;  %v1113_v15 = vmul.f32 -1.442695, %v155_v14 }
  0x93   :  { %1150 = vpow2.f32 %v1113_v15 }
  0x99   :  { %v1151_v16 = vpop.eup %1150 }
  0x9a   :  { %v159_v17 = vadd.f32 1.0, %v1151_v16 }
  0x9c   :  { %1152 = vrcp.f32 %v159_v17  ;;  %v171_v23 = vand.u32 2147483648, %v159_v17  ;;  %vm165_vm6 = vweird.f32 %v159_v17  ;;  %v169_v24 = vand.u32 2147483647, %v159_v17 }
  0x9e   :  { %v172_v26 = vor.u32 1.1754944e-38, %v171_v23  ;;  %vm170_vm8 = vcmp.eq.f32.partialorder %v169_v24, 8.507059e+37 }
  0xa2   :  { %v1153_v18 = vpop.eup %1152 }
  0xa3   :  { %v161_v19 = vmul.f32 %v1153_v18, %v159_v17  ;;  %vm166_vm5 = vweird.f32 %v1153_v18 }
  0xa4   :  { %vm167_vm7 = vmor %vm165_vm6, %vm166_vm5 }
  0xa5   :  { %v162_v20 = vsub.f32 1.0, %v161_v19 }
  0xa7   :  { %v163_v21 = vmul.f32 %v1153_v18, %v162_v20 }
  0xa9   :  { %v164_v22 = vadd.f32 %v1153_v18, %v163_v21 }
  0xab   :  { %v168_v25 = vsel %vm167_vm7, %v1153_v18, %v164_v22 }
  0xac   :  { %v173_v27 = vsel %vm170_vm8, %v172_v26, %v168_v25 }
  0xad   :  { %v192_v34 = vsub.f32 1.0, %v173_v27  ;;  %v201_v36 = vmul.f32 %v199_v33, %v173_v27 }
 0x103   :  { %v183_v28 = vpop.permute.xlu0 %182 }
 0x104   :  { %v185_v29 = vmul.f32 %v183_v28, %v173_v27 }
 0x106   :  { %187 = vrot.lane.b32.xlu1 %v185_v29, %s1228_s3 }
 0x178   :  { %v188_v30 = vpop.permute.xlu1 %187 }
 0x179   :  { %v190_v31 = vadd.f32 %v188_v30, %v1350_v13 }
 0x17b   :  { %1154 = vtanh.f32 %v190_v31 }
 0x181   :  { %v1155_v32 = vpop.eup %1154 }
 0x182   :  { %194 = vrot.lane.b32.xlu1 %v1155_v32, %s1231_s4 }
 0x1f4   :  { %v195_v35 = vpop.permute.xlu1 %194 }
 0x1f5   :  { %v197_v37 = vmul.f32 %v195_v35, %v192_v34 }
 0x1f7   :  { %v202_v38 = vadd.f32 %v201_v36, %v197_v37 }
 0x1f9   :  { %204 = vrot.lane.b32.xlu2 %v202_v38, %s1231_s4  ;;  %v270_v63 = vrot.slane %v202_v38, 6 }
 0x253   :  { %v205_v39 = vpop.permute.xlu2 %204 }
 0x254   :  { %1114 = vmatmul.msk.f32.vlgmr.msra.gmra.mxu3 %vm131_vm4, %v205_v39 }
 0x255   :  { %649 = vmatpush.msra.mxu3 %v1311_v2 }
 0x2d7   :  { %v225_v40 = vpop.f32.mrf.mxu3 }
 0x2d8   :  { %v251_v41 = vadd.f32 %v225_v40, %v1340_v8  ;;  %v229_v43 = vrot.slane %v225_v40, 6 }
 0x2da   :  { %v253_v42 = vrot.slane %v251_v41, 6  ;;  %v231_v44 = vadd.f32 %v229_v43, %v1350_v13 }
 0x2dc   :  { %254 = vrot.lane.b32.xlu0 %v253_v42, %s1230_s2  ;;  %v1115_v45 = vmul.f32 -1.442695, %v231_v44 }
 0x2de   :  { %1156 = vpow2.f32 %v1115_v45 }
 0x2e4   :  { %v1157_v46 = vpop.eup %1156 }
 0x2e5   :  { %v235_v47 = vadd.f32 1.0, %v1157_v46 }
 0x2e7   :  { %1158 = vrcp.f32 %v235_v47  ;;  %v247_v53 = vand.u32 2147483648, %v235_v47  ;;  %vm241_vm10 = vweird.f32 %v235_v47  ;;  %v245_v54 = vand.u32 2147483647, %v235_v47 }
 0x2e9   :  { %v248_v56 = vor.u32 1.1754944e-38, %v247_v53  ;;  %vm246_vm12 = vcmp.eq.f32.partialorder %v245_v54, 8.507059e+37 }
 0x2ed   :  { %v1159_v48 = vpop.eup %1158 }
 0x2ee   :  { %v237_v49 = vmul.f32 %v1159_v48, %v235_v47  ;;  %vm242_vm9 = vweird.f32 %v1159_v48 }
 0x2ef   :  { %vm243_vm11 = vmor %vm241_vm10, %vm242_vm9 }
 0x2f0   :  { %v238_v50 = vsub.f32 1.0, %v237_v49 }
 0x2f2   :  { %v239_v51 = vmul.f32 %v1159_v48, %v238_v50 }
 0x2f4   :  { %v240_v52 = vadd.f32 %v1159_v48, %v239_v51 }
 0x2f6   :  { %v244_v55 = vsel %vm243_vm11, %v1159_v48, %v240_v52 }
 0x2f7   :  { %v249_v58 = vsel %vm246_vm12, %v248_v56, %v244_v55 }
 0x2f8   :  { %v264_v0 = vsub.f32 1.0, %v249_v58  ;;  %v272_v3 = vmul.f32 %v270_v63, %v249_v58 }
 0x34e   :  { %v255_v57 = vpop.permute.xlu0 %254 }
 0x34f   :  { %v257_v59 = vmul.f32 %v255_v57, %v249_v58 }
 0x351   :  { %259 = vrot.lane.b32.xlu1 %v257_v59, %s1228_s3 }
 0x3c3   :  { %v260_v60 = vpop.permute.xlu1 %259 }
 0x3c4   :  { %v262_v61 = vadd.f32 %v260_v60, %v1350_v13 }
 0x3c6   :  { %1160 = vtanh.f32 %v262_v61 }
 0x3cc   :  { %v1161_v62 = vpop.eup %1160 }
 0x3cd   :  { %266 = vrot.lane.b32.xlu2 %v1161_v62, %s1231_s4 }
 0x427   :  { %v267_v1 = vpop.permute.xlu2 %266 }
 0x428   :  { %v269_v2 = vmul.f32 %v267_v1, %v264_v0 }
 0x42a   :  { %v273_v4 = vadd.f32 %v272_v3, %v269_v2  ;;  %v50_v3 = vld [vmem:[%s1511_s0 + $0x8] sm:$0xff] }
 0x42b   :  { %1108 = vmatmul.msk.f32.gmra.mxu0 %vm56_vm3, %v50_v3 }
 0x42c   :  { %v275_v5 = vrot.slane %v273_v4, 2  ;;  %v342_v34 = vrot.slane %v273_v4, 6 }
 0x42e   :  { %276 = vrot.lane.b32.xlu0 %v275_v5, %s1231_s4 }
 0x4a0   :  { %v277_v6 = vpop.permute.xlu0 %276 }
 0x4a1   :  { %1116 = vmatmul.msk.f32.vlgmr.msra.gmra.mxu2 %vm131_vm4, %v277_v6 }
 0x524   :  { %v297_v9 = vpop.f32.mrf.mxu2 }
 0x525   :  { %v323_v10 = vadd.f32 %v297_v9, %v1340_v8  ;;  %v301_v14 = vrot.slane %v297_v9, 4 }
 0x527   :  { %v325_v12 = vrot.slane %v323_v10, 4  ;;  %v303_v15 = vadd.f32 %v301_v14, %v1350_v13 }
 0x529   :  { %326 = vrot.lane.b32.xlu1 %v325_v12, %s1230_s2  ;;  %v1117_v16 = vmul.f32 -1.442695, %v303_v15 }
 0x52b   :  { %1162 = vpow2.f32 %v1117_v16 }
 0x531   :  { %v1163_v17 = vpop.eup %1162 }
 0x532   :  { %v307_v18 = vadd.f32 1.0, %v1163_v17 }
 0x534   :  { %1164 = vrcp.f32 %v307_v18  ;;  %v319_v24 = vand.u32 2147483648, %v307_v18  ;;  %vm313_vm14 = vweird.f32 %v307_v18  ;;  %v317_v25 = vand.u32 2147483647, %v307_v18 }
 0x536   :  { %v320_v27 = vor.u32 1.1754944e-38, %v319_v24  ;;  %vm318_vm2 = vcmp.eq.f32.partialorder %v317_v25, 8.507059e+37 }
 0x53a   :  { %v1165_v19 = vpop.eup %1164 }
 0x53b   :  { %v309_v20 = vmul.f32 %v1165_v19, %v307_v18  ;;  %vm314_vm13 = vweird.f32 %v1165_v19 }
 0x53c   :  { %vm315_vm15 = vmor %vm313_vm14, %vm314_vm13 }
 0x53d   :  { %v310_v21 = vsub.f32 1.0, %v309_v20 }
 0x53f   :  { %v311_v22 = vmul.f32 %v1165_v19, %v310_v21 }
 0x541   :  { %v312_v23 = vadd.f32 %v1165_v19, %v311_v22 }
 0x543   :  { %v316_v26 = vsel %vm315_vm15, %v1165_v19, %v312_v23 }
 0x544   :  { %v321_v29 = vsel %vm318_vm2, %v320_v27, %v316_v26 }
 0x545   :  { %v336_v35 = vsub.f32 1.0, %v321_v29  ;;  %v344_v37 = vmul.f32 %v342_v34, %v321_v29 }
 0x59b   :  { %v327_v28 = vpop.permute.xlu1 %326 }
 0x59c   :  { %v329_v30 = vmul.f32 %v327_v28, %v321_v29 }
 0x59e   :  { %331 = vrot.lane.b32.xlu2 %v329_v30, %s1228_s3 }
 0x5f8   :  { %v332_v31 = vpop.permute.xlu2 %331 }
 0x5f9   :  { %v334_v32 = vadd.f32 %v332_v31, %v1350_v13 }
 0x5fb   :  { %1166 = vtanh.f32 %v334_v32 }
 0x601   :  { %v1167_v33 = vpop.eup %1166 }
 0x602   :  { %338 = vrot.lane.b32.xlu0 %v1167_v33, %s1231_s4 }
 0x674   :  { %v339_v36 = vpop.permute.xlu0 %338 }
 0x675   :  { %v341_v38 = vmul.f32 %v339_v36, %v336_v35  ;;  %v90_v35 = vld [vmem:[%s1508_s1] sm:$0xff] }
 0x676   :  { %1110 = vmatmul.msk.f32.vlgmr.msra.gmra.mxu1 %vm97_vm1, %v90_v35 }
 0x677   :  { %v345_v39 = vadd.f32 %v344_v37, %v341_v38 }
 0x679   :  { %v347_v40 = vrot.slane %v345_v39, 4  ;;  %v414_v58 = vrot.slane %v345_v39, 6 }
 0x67b   :  { %348 = vrot.lane.b32.xlu1 %v347_v40, %s1231_s4 }
 0x6ed   :  { %v349_v41 = vpop.permute.xlu1 %348 }
 0x6ee   :  { %1118 = vmatmul.msk.f32.vlgmr.msrb.gmra.mxu3 %vm131_vm4, %v349_v41 }
 0x771   :  { %v369_v42 = vpop.f32.mrf.mxu3 }
 0x772   :  { %v373_v43 = vrot.slane %v369_v42, 2  ;;  %v395_v44 = vadd.f32 %v369_v42, %v1340_v8  ;;  %v1402_v42 = vpop.f32.mrf.mxu1 }
 0x774   :  { %v375_v45 = vadd.f32 %v373_v43, %v1350_v13  ;;  %v397_v46 = vrot.slane %v395_v44, 2 }
 0x776   :  { %v1119_v47 = vmul.f32 -1.442695, %v375_v45  ;;  %398 = vrot.lane.b32.xlu2 %v397_v46, %s1230_s2 }
 0x778   :  { %1168 = vpow2.f32 %v1119_v47 }
 0x77e   :  { %v1169_v48 = vpop.eup %1168 }
 0x77f   :  { %v379_v49 = vadd.f32 1.0, %v1169_v48 }
 0x781   :  { %1170 = vrcp.f32 %v379_v49  ;;  %v391_v53 = vand.u32 2147483648, %v379_v49  ;;  %v389_v55 = vand.u32 2147483647, %v379_v49  ;;  %vm385_vm6 = vweird.f32 %v379_v49 }
 0x783   :  { %v392_v57 = vor.u32 1.1754944e-38, %v391_v53  ;;  %vm390_vm8 = vcmp.eq.f32.partialorder %v389_v55, 8.507059e+37 }
 0x787   :  { %v1171_v50 = vpop.eup %1170 }
 0x788   :  { %v381_v51 = vmul.f32 %v1171_v50, %v379_v49  ;;  %vm386_vm5 = vweird.f32 %v1171_v50 }
 0x789   :  { %vm387_vm7 = vmor %vm385_vm6, %vm386_vm5 }
 0x78a   :  { %v382_v52 = vsub.f32 1.0, %v381_v51 }
 0x78c   :  { %v383_v54 = vmul.f32 %v1171_v50, %v382_v52 }
 0x78e   :  { %v384_v56 = vadd.f32 %v1171_v50, %v383_v54 }
 0x790   :  { %v388_v59 = vsel %vm387_vm7, %v1171_v50, %v384_v56 }
 0x791   :  { %v393_v60 = vsel %vm390_vm8, %v392_v57, %v388_v59 }
 0x792   :  { %v416_v61 = vmul.f32 %v414_v58, %v393_v60  ;;  %v408_v4 = vsub.f32 1.0, %v393_v60 }
 0x7d0   :  { %v399_v62 = vpop.permute.xlu2 %398 }
 0x7d1   :  { %v401_v63 = vmul.f32 %v399_v62, %v393_v60 }
 0x7d3   :  { %403 = vrot.lane.b32.xlu0 %v401_v63, %s1228_s3 }
 0x845   :  { %v404_v0 = vpop.permute.xlu0 %403 }
 0x846   :  { %v406_v1 = vadd.f32 %v404_v0, %v1350_v13  ;;  %v87_v13 = vpop.f32.mrf.mxu0 }
 0x847   :  { %v1390_v16 = vadd.f32 %v1347_v11, %v87_v13 }
 0x848   :  { %1172 = vtanh.f32 %v406_v1 }
 0x84e   :  { %v1173_v2 = vpop.eup %1172 }
 0x84f   :  { %410 = vrot.lane.b32.xlu1 %v1173_v2, %s1231_s4 }
 0x8c1   :  { %v411_v5 = vpop.permute.xlu1 %410 }
 0x8c2   :  { %v413_v6 = vmul.f32 %v411_v5, %v408_v4 }
 0x8c4   :  { %v417_v9 = vadd.f32 %v416_v61, %v413_v6 }
 0x8c6   :  { %v419_v10 = vrot.slane %v417_v9, 6 }
 0x8c8   :  { %420 = vrot.lane.b32.xlu2 %v419_v10, %s1231_s4 }
 0x922   :  { %v421_v12 = vpop.permute.xlu2 %420 }
 0x923   :  { %1120 = vmatmul.msk.f32.vlgmr.msrb.gmra.mxu0 %vm131_vm4, %v421_v12 }
 0x9a0   :  { %v441_v14 = vpop.f32.mrf.mxu0 }
 0x9a1   :  { %v464_v15 = vadd.f32 %v441_v14, %v1340_v8  ;;  %v444_v17 = vadd.f32 %v441_v14, %v1390_v16 }
 0x9a3   :  { %466 = vrot.lane.b32.xlu0 %v464_v15, %s1230_s2  ;;  %v1121_v18 = vmul.f32 -1.442695, %v444_v17 }
 0x9a5   :  { %1174 = vpow2.f32 %v1121_v18 }
 0x9ab   :  { %v1175_v19 = vpop.eup %1174 }
 0x9ac   :  { %v448_v20 = vadd.f32 1.0, %v1175_v19 }
 0x9ae   :  { %1176 = vrcp.f32 %v448_v20  ;;  %v460_v26 = vand.u32 2147483648, %v448_v20  ;;  %vm454_vm9 = vweird.f32 %v448_v20  ;;  %v458_v27 = vand.u32 2147483647, %v448_v20 }
 0x9b0   :  { %v461_v11 = vor.u32 1.1754944e-38, %v460_v26  ;;  %vm459_vm11 = vcmp.eq.f32.partialorder %v458_v27, 8.507059e+37 }
 0x9b4   :  { %v1177_v21 = vpop.eup %1176 }
 0x9b5   :  { %v450_v22 = vmul.f32 %v1177_v21, %v448_v20  ;;  %vm455_vm3 = vweird.f32 %v1177_v21 }
 0x9b6   :  { %vm456_vm10 = vmor %vm454_vm9, %vm455_vm3 }
 0x9b7   :  { %v451_v23 = vsub.f32 1.0, %v450_v22 }
 0x9b9   :  { %v452_v24 = vmul.f32 %v1177_v21, %v451_v23 }
 0x9bb   :  { %v453_v25 = vadd.f32 %v1177_v21, %v452_v24 }
 0x9bd   :  { %v457_v28 = vsel %vm456_vm10, %v1177_v21, %v453_v25 }
 0x9be   :  { %v462_v30 = vsel %vm459_vm11, %v461_v11, %v457_v28 }
 0x9bf   :  { %v476_v36 = vsub.f32 1.0, %v462_v30  ;;  %v483_v38 = vmul.f32 %v462_v30, %v419_v10 }
 0xa15   :  { %v467_v29 = vpop.permute.xlu0 %466 }
 0xa16   :  { %v469_v31 = vmul.f32 %v467_v29, %v462_v30 }
 0xa18   :  { %471 = vrot.lane.b32.xlu1 %v469_v31, %s1228_s3 }
 0xa8a   :  { %v472_v32 = vpop.permute.xlu1 %471 }
 0xa8b   :  { %v474_v33 = vadd.f32 %v472_v32, %v1390_v16 }
 0xa8d   :  { %1178 = vtanh.f32 %v474_v33 }
 0xa93   :  { %v1179_v34 = vpop.eup %1178 }
 0xa94   :  { %478 = vrot.lane.b32.xlu2 %v1179_v34, %s1231_s4 }
 0xaee   :  { %v479_v37 = vpop.permute.xlu2 %478 }
 0xaef   :  { %v481_v39 = vmul.f32 %v479_v37, %v476_v36 }
 0xaf1   :  { %v484_v40 = vadd.f32 %v483_v38, %v481_v39 }
 0xaf3   :  { %486 = vrot.lane.b32.xlu0 %v484_v40, %s1231_s4  ;;  %v552_v2 = vrot.slane %v484_v40, 6 }
 0xb65   :  { %v487_v41 = vpop.permute.xlu0 %486 }
 0xb66   :  { %1122 = vmatmul.msk.f32.vlgmr.msrb.gmra.mxu1 %vm131_vm4, %v487_v41 }
 0xbe3   :  { %v507_v43 = vpop.f32.mrf.mxu1 }
 0xbe4   :  { %v533_v44 = vadd.f32 %v507_v43, %v1340_v8  ;;  %v511_v46 = vrot.slane %v507_v43, 6 }
 0xbe6   :  { %v535_v45 = vrot.slane %v533_v44, 6  ;;  %v513_v47 = vadd.f32 %v511_v46, %v1390_v16 }
 0xbe8   :  { %536 = vrot.lane.b32.xlu1 %v535_v45, %s1230_s2  ;;  %v1123_v48 = vmul.f32 -1.442695, %v513_v47 }
 0xbea   :  { %1180 = vpow2.f32 %v1123_v48 }
 0xbf0   :  { %v1181_v49 = vpop.eup %1180 }
 0xbf1   :  { %v517_v50 = vadd.f32 1.0, %v1181_v49 }
 0xbf3   :  { %1182 = vrcp.f32 %v517_v50  ;;  %v529_v56 = vand.u32 2147483648, %v517_v50  ;;  %vm523_vm13 = vweird.f32 %v517_v50  ;;  %v527_v57 = vand.u32 2147483647, %v517_v50 }
 0xbf5   :  { %v530_v59 = vor.u32 1.1754944e-38, %v529_v56  ;;  %vm528_vm15 = vcmp.eq.f32.partialorder %v527_v57, 8.507059e+37 }
 0xbf9   :  { %v1183_v51 = vpop.eup %1182 }
 0xbfa   :  { %v519_v52 = vmul.f32 %v1183_v51, %v517_v50  ;;  %vm524_vm12 = vweird.f32 %v1183_v51 }
 0xbfb   :  { %vm525_vm14 = vmor %vm523_vm13, %vm524_vm12 }
 0xbfc   :  { %v520_v53 = vsub.f32 1.0, %v519_v52 }
 0xbfe   :  { %v521_v54 = vmul.f32 %v1183_v51, %v520_v53 }
 0xc00   :  { %v522_v55 = vadd.f32 %v1183_v51, %v521_v54 }
 0xc02   :  { %v526_v58 = vsel %vm525_vm14, %v1183_v51, %v522_v55 }
 0xc03   :  { %v531_v61 = vsel %vm528_vm15, %v530_v59, %v526_v58 }
 0xc04   :  { %v546_v3 = vsub.f32 1.0, %v531_v61  ;;  %v554_v6 = vmul.f32 %v552_v2, %v531_v61 }
 0xc5a   :  { %v537_v60 = vpop.permute.xlu1 %536 }
 0xc5b   :  { %v539_v62 = vmul.f32 %v537_v60, %v531_v61 }
 0xc5d   :  { %541 = vrot.lane.b32.xlu2 %v539_v62, %s1228_s3 }
 0xcb7   :  { %v542_v63 = vpop.permute.xlu2 %541 }
 0xcb8   :  { %v544_v0 = vadd.f32 %v542_v63, %v1390_v16 }
 0xcba   :  { %1184 = vtanh.f32 %v544_v0 }
 0xcc0   :  { %v1185_v1 = vpop.eup %1184 }
 0xcc1   :  { %548 = vrot.lane.b32.xlu0 %v1185_v1, %s1231_s4 }
 0xd33   :  { %v549_v4 = vpop.permute.xlu0 %548 }
 0xd34   :  { %v551_v5 = vmul.f32 %v549_v4, %v546_v3  ;;  %v47_v3 = vld [vmem:[%s1516_s9] sm:$0xff] }
 0xd35   :  { %721 = vmatpush.msra.mxu0 %v47_v3  ;;  %792 = vmatpush.msra.mxu1 %v47_v3 }
 0xd36   :  { %v555_v9 = vadd.f32 %v554_v6, %v551_v5  ;;  %864 = vmatpush.msra.mxu2 %v47_v3  ;;  %936 = vmatpush.msrb.mxu3 %v47_v3 }
 0xd37   :  { %1008 = vmatpush.msrb.mxu0 %v47_v3 }
 0xd38   :  { %v557_v10 = vrot.slane %v555_v9, 2  ;;  %v624_v29 = vrot.slane %v555_v9, 6 }
 0xd3a   :  { %558 = vrot.lane.b32.xlu1 %v557_v10, %s1231_s4 }
 0xdac   :  { %v559_v12 = vpop.permute.xlu1 %558 }
 0xdad   :  { %1124 = vmatmul.msk.f32.vlgmr.msrb.gmra.mxu2 %vm131_vm4, %v559_v12 }
 0xe30   :  { %v579_v13 = vpop.f32.mrf.mxu2 }
 0xe31   :  { %v583_v14 = vrot.slane %v579_v13, 4  ;;  %v605_v15 = vadd.f32 %v579_v13, %v1340_v8  ;;  %v1148_v13 = vld [vmem:[%s1517_s10] ss:$0 sm:$0xff] }
 0xe33   :  { %v585_v17 = vadd.f32 %v583_v14, %v1390_v16  ;;  %v607_v18 = vrot.slane %v605_v15, 4 }
 0xe35   :  { %v1125_v19 = vmul.f32 -1.442695, %v585_v17  ;;  %608 = vrot.lane.b32.xlu2 %v607_v18, %s1230_s2 }
 0xe37   :  { %1186 = vpow2.f32 %v1125_v19  ;;  %v1442_v19 = vld [vmem:[%s1514_s8] ss:$0 sm:$0xff] }
 0xe3d   :  { %v1187_v20 = vpop.eup %1186 }
 0xe3e   :  { %v589_v21 = vadd.f32 1.0, %v1187_v20  ;;  %v1446_v20 = vadd.f32 %v1442_v19, %v1402_v42 }
 0xe40   :  { %1188 = vrcp.f32 %v589_v21  ;;  %v601_v25 = vand.u32 2147483648, %v589_v21  ;;  %v599_v27 = vand.u32 2147483647, %v589_v21  ;;  %vm595_vm5 = vweird.f32 %v589_v21 }
 0xe42   :  { %v602_v11 = vor.u32 1.1754944e-38, %v601_v25  ;;  %vm600_vm7 = vcmp.eq.f32.partialorder %v599_v27, 8.507059e+37 }
 0xe46   :  { %v1189_v22 = vpop.eup %1188 }
 0xe47   :  { %v591_v23 = vmul.f32 %v1189_v22, %v589_v21  ;;  %vm596_vm2 = vweird.f32 %v1189_v22 }
 0xe48   :  { %vm597_vm6 = vmor %vm595_vm5, %vm596_vm2 }
 0xe49   :  { %v592_v24 = vsub.f32 1.0, %v591_v23 }
 0xe4b   :  { %v593_v26 = vmul.f32 %v1189_v22, %v592_v24 }
 0xe4d   :  { %v594_v28 = vadd.f32 %v1189_v22, %v593_v26 }
 0xe4f   :  { %v598_v30 = vsel %vm597_vm6, %v1189_v22, %v594_v28 }
 0xe50   :  { %v603_v31 = vsel %vm600_vm7, %v602_v11, %v598_v30 }
 0xe51   :  { %v626_v32 = vmul.f32 %v624_v29, %v603_v31  ;;  %v618_v38 = vsub.f32 1.0, %v603_v31 }
 0xe8f   :  { %v609_v33 = vpop.permute.xlu2 %608 }
 0xe90   :  { %v611_v34 = vmul.f32 %v609_v33, %v603_v31 }
 0xe92   :  { %613 = vrot.lane.b32.xlu0 %v611_v34, %s1228_s3 }
 0xf04   :  { %v614_v35 = vpop.permute.xlu0 %613 }
 0xf05   :  { %v616_v36 = vadd.f32 %v614_v35, %v1390_v16 }
 0xf07   :  { %1190 = vtanh.f32 %v616_v36 }
 0xf0d   :  { %v1191_v37 = vpop.eup %1190 }
 0xf0e   :  { %620 = vrot.lane.b32.xlu1 %v1191_v37, %s1231_s4 }
 0xf80   :  { %v621_v39 = vpop.permute.xlu1 %620 }
 0xf81   :  { %v623_v40 = vmul.f32 %v621_v39, %v618_v38 }
 0xf83   :  { %v627_v41 = vadd.f32 %v626_v32, %v623_v40 }
 0xf85   :  { %v629_v43 = vrot.slane %v627_v41, 4  ;;  %v696_v4 = vrot.slane %v627_v41, 6 }
 0xf87   :  { %630 = vrot.lane.b32.xlu2 %v629_v43, %s1231_s4 }
 0xfe1   :  { %v631_v44 = vpop.permute.xlu2 %630 }
 0xfe2   :  { %1126 = vmatmul.msk.f32.vlgmr.msra.gmra.mxu3 %vm131_vm4, %v631_v44 }
0x1065   :  { %v651_v45 = vpop.f32.mrf.mxu3 }
0x1066   :  { %v677_v46 = vadd.f32 %v651_v45, %v1340_v8  ;;  %v655_v48 = vrot.slane %v651_v45, 2 }
0x1068   :  { %v679_v47 = vrot.slane %v677_v46, 2  ;;  %v657_v49 = vadd.f32 %v655_v48, %v1390_v16 }
0x106a   :  { %680 = vrot.lane.b32.xlu0 %v679_v47, %s1230_s2  ;;  %v1127_v50 = vmul.f32 -1.442695, %v657_v49 }
0x106c   :  { %1192 = vpow2.f32 %v1127_v50 }
0x1072   :  { %v1193_v51 = vpop.eup %1192 }
0x1073   :  { %v661_v52 = vadd.f32 1.0, %v1193_v51 }
0x1075   :  { %1194 = vrcp.f32 %v661_v52  ;;  %v673_v58 = vand.u32 2147483648, %v661_v52  ;;  %vm667_vm3 = vweird.f32 %v661_v52  ;;  %v671_v8 = vand.u32 2147483647, %v661_v52 }
0x1077   :  { %v674_v60 = vor.u32 1.1754944e-38, %v673_v58  ;;  %vm672_vm10 = vcmp.eq.f32.partialorder %v671_v8, 8.507059e+37 }
0x107b   :  { %v1195_v53 = vpop.eup %1194 }
0x107c   :  { %v663_v54 = vmul.f32 %v1195_v53, %v661_v52  ;;  %vm668_vm8 = vweird.f32 %v1195_v53 }
0x107d   :  { %vm669_vm9 = vmor %vm667_vm3, %vm668_vm8 }
0x107e   :  { %v664_v55 = vsub.f32 1.0, %v663_v54 }
0x1080   :  { %v665_v56 = vmul.f32 %v1195_v53, %v664_v55 }
0x1082   :  { %v666_v57 = vadd.f32 %v1195_v53, %v665_v56 }
0x1084   :  { %v670_v59 = vsel %vm669_vm9, %v1195_v53, %v666_v57 }
0x1085   :  { %v675_v62 = vsel %vm672_vm10, %v674_v60, %v670_v59  ;;  %vm1054_vm10 = vcmask 1041408  }
0x1086   :  { %v690_v5 = vsub.f32 1.0, %v675_v62  ;;  %v698_v9 = vmul.f32 %v696_v4, %v675_v62 }
0x10dc   :  { %v681_v61 = vpop.permute.xlu0 %680 }
0x10dd   :  { %v683_v63 = vmul.f32 %v681_v61, %v675_v62 }
0x10df   :  { %685 = vrot.lane.b32.xlu1 %v683_v63, %s1228_s3 }
0x10e7   :  { %748 = vrot.lane.b32.xlu1 %v1148_v13, %s1228_s3 }
0x1151   :  { %v686_v0 = vpop.permute.xlu1 %685 }
0x1152   :  { %v688_v1 = vadd.f32 %v686_v0, %v1390_v16 }
0x1154   :  { %1196 = vtanh.f32 %v688_v1 }
0x1159   :  { %v1435_v15 = vpop.permute.xlu1 %748 }
0x115a   :  { %v1197_v2 = vpop.eup %1196 }
0x115b   :  { %692 = vrot.lane.b32.xlu2 %v1197_v2, %s1231_s4 }
0x11b5   :  { %v693_v6 = vpop.permute.xlu2 %692 }
0x11b6   :  { %v695_v10 = vmul.f32 %v693_v6, %v690_v5 }
0x11b8   :  { %v699_v12 = vadd.f32 %v698_v9, %v695_v10 }
0x11ba   :  { %v701_v16 = vrot.slane %v699_v12, 6 }
0x11bc   :  { %702 = vrot.lane.b32.xlu0 %v701_v16, %s1231_s4 }
0x122e   :  { %v703_v14 = vpop.permute.xlu0 %702 }
0x122f   :  { %1128 = vmatmul.msk.f32.vlgmr.msra.gmra.mxu0 %vm131_vm4, %v703_v14 }
0x12ac   :  { %v723_v17 = vpop.f32.mrf.mxu0 }
0x12ad   :  { %v751_v18 = vadd.f32 %v1435_v15, %v723_v17  ;;  %v726_v21 = vadd.f32 %v723_v17, %v1446_v20 }
0x12af   :  { %753 = vrot.lane.b32.xlu2 %v751_v18, %s1230_s2  ;;  %v1129_v22 = vmul.f32 -1.442695, %v726_v21 }
0x12b1   :  { %1198 = vpow2.f32 %v1129_v22 }
0x12b7   :  { %v1199_v23 = vpop.eup %1198 }
0x12b8   :  { %v730_v24 = vadd.f32 1.0, %v1199_v23 }
0x12ba   :  { %1200 = vrcp.f32 %v730_v24  ;;  %v742_v29 = vand.u32 2147483648, %v730_v24  ;;  %vm736_vm12 = vweird.f32 %v730_v24  ;;  %v740_v30 = vand.u32 2147483647, %v730_v24 }
0x12bc   :  { %v743_v42 = vor.u32 1.1754944e-38, %v742_v29  ;;  %vm741_vm14 = vcmp.eq.f32.partialorder %v740_v30, 8.507059e+37 }
0x12c0   :  { %v1201_v25 = vpop.eup %1200 }
0x12c1   :  { %v732_v26 = vmul.f32 %v1201_v25, %v730_v24  ;;  %vm737_vm11 = vweird.f32 %v1201_v25 }
0x12c2   :  { %vm738_vm13 = vmor %vm736_vm12, %vm737_vm11  ;;  %vm1056_vm11 = vcmask 1043456  }
0x12c3   :  { %v733_v27 = vsub.f32 1.0, %v732_v26 }
0x12c5   :  { %v734_v28 = vmul.f32 %v1201_v25, %v733_v27 }
0x12c7   :  { %v735_v11 = vadd.f32 %v1201_v25, %v734_v28 }
0x12c9   :  { %v739_v31 = vsel %vm738_vm13, %v1201_v25, %v735_v11 }
0x12ca   :  { %v744_v32 = vsel %vm741_vm14, %v743_v42, %v739_v31 }
0x12cb   :  { %v763_v38 = vsub.f32 1.0, %v744_v32  ;;  %v770_v40 = vmul.f32 %v744_v32, %v701_v16 }
0x1309   :  { %v754_v33 = vpop.permute.xlu2 %753 }
0x130a   :  { %v756_v34 = vmul.f32 %v754_v33, %v744_v32 }
0x130c   :  { %758 = vrot.lane.b32.xlu0 %v756_v34, %s1228_s3 }
0x137e   :  { %v759_v35 = vpop.permute.xlu0 %758 }
0x137f   :  { %v761_v36 = vadd.f32 %v759_v35, %v1446_v20 }
0x1381   :  { %1202 = vtanh.f32 %v761_v36 }
0x1387   :  { %v1203_v37 = vpop.eup %1202 }
0x1388   :  { %765 = vrot.lane.b32.xlu1 %v1203_v37, %s1231_s4 }
0x13fa   :  { %v766_v39 = vpop.permute.xlu1 %765 }
0x13fb   :  { %v768_v41 = vmul.f32 %v766_v39, %v763_v38 }
0x13fd   :  { %v1452_v43 = vadd.f32 %v770_v40, %v768_v41 }
0x13ff   :  { %773 = vrot.lane.b32.xlu2 %v1452_v43, %s1231_s4  ;;  %v839_v4 = vrot.slane %v1452_v43, 6 }
0x1459   :  { %v774_v44 = vpop.permute.xlu2 %773 }
0x145a   :  { %1130 = vmatmul.msk.f32.vlgmr.msra.gmra.mxu1 %vm131_vm4, %v774_v44 }
0x14d7   :  { %v794_v45 = vpop.f32.mrf.mxu1 }
0x14d8   :  { %v820_v46 = vadd.f32 %v794_v45, %v1435_v15  ;;  %v798_v48 = vrot.slane %v794_v45, 6 }
0x14da   :  { %v822_v47 = vrot.slane %v820_v46, 6  ;;  %v800_v49 = vadd.f32 %v798_v48, %v1446_v20 }
0x14dc   :  { %823 = vrot.lane.b32.xlu0 %v822_v47, %s1230_s2  ;;  %v1131_v50 = vmul.f32 -1.442695, %v800_v49 }
0x14de   :  { %1204 = vpow2.f32 %v1131_v50 }
0x14e4   :  { %v1205_v51 = vpop.eup %1204 }
0x14e5   :  { %v804_v52 = vadd.f32 1.0, %v1205_v51 }
0x14e7   :  { %1206 = vrcp.f32 %v804_v52  ;;  %v816_v58 = vand.u32 2147483648, %v804_v52  ;;  %vm810_vm2 = vweird.f32 %v804_v52  ;;  %v814_v8 = vand.u32 2147483647, %v804_v52 }
0x14e9   :  { %v817_v60 = vor.u32 1.1754944e-38, %v816_v58  ;;  %vm815_vm6 = vcmp.eq.f32.partialorder %v814_v8, 8.507059e+37 }
0x14ed   :  { %v1207_v53 = vpop.eup %1206 }
0x14ee   :  { %v806_v54 = vmul.f32 %v1207_v53, %v804_v52  ;;  %vm811_vm15 = vweird.f32 %v1207_v53 }
0x14ef   :  { %vm812_vm5 = vmor %vm810_vm2, %vm811_vm15 }
0x14f0   :  { %v807_v55 = vsub.f32 1.0, %v806_v54 }
0x14f2   :  { %v808_v56 = vmul.f32 %v1207_v53, %v807_v55 }
0x14f4   :  { %v809_v57 = vadd.f32 %v1207_v53, %v808_v56 }
0x14f6   :  { %v813_v59 = vsel %vm812_vm5, %v1207_v53, %v809_v57 }
0x14f7   :  { %v818_v62 = vsel %vm815_vm6, %v817_v60, %v813_v59 }
0x14f8   :  { %v833_v3 = vsub.f32 1.0, %v818_v62  ;;  %v841_v9 = vmul.f32 %v839_v4, %v818_v62 }
0x154e   :  { %v824_v61 = vpop.permute.xlu0 %823 }
0x154f   :  { %v826_v63 = vmul.f32 %v824_v61, %v818_v62 }
0x1551   :  { %828 = vrot.lane.b32.xlu1 %v826_v63, %s1228_s3 }
0x15c3   :  { %v829_v0 = vpop.permute.xlu1 %828 }
0x15c4   :  { %v831_v1 = vadd.f32 %v829_v0, %v1446_v20 }
0x15c6   :  { %1208 = vtanh.f32 %v831_v1 }
0x15cc   :  { %v1209_v2 = vpop.eup %1208 }
0x15cd   :  { %835 = vrot.lane.b32.xlu2 %v1209_v2, %s1231_s4 }
0x1627   :  { %v836_v5 = vpop.permute.xlu2 %835 }
0x1628   :  { %v838_v6 = vmul.f32 %v836_v5, %v833_v3 }
0x162a   :  { %v842_v10 = vadd.f32 %v841_v9, %v838_v6 }
0x162c   :  { %v844_v12 = vrot.slane %v842_v10, 2  ;;  %v911_v39 = vrot.slane %v842_v10, 6  ;;  %v1055_v46 = vsel %vm1054_vm10, %v1452_v43, %v842_v10 }
0x162e   :  { %845 = vrot.lane.b32.xlu0 %v844_v12, %s1231_s4 }
0x16a0   :  { %v846_v16 = vpop.permute.xlu0 %845 }
0x16a1   :  { %1132 = vmatmul.msk.f32.vlgmr.msra.gmra.mxu2 %vm131_vm4, %v846_v16 }
0x1724   :  { %v866_v13 = vpop.f32.mrf.mxu2 }
0x1725   :  { %v892_v14 = vadd.f32 %v866_v13, %v1435_v15  ;;  %v870_v18 = vrot.slane %v866_v13, 4 }
0x1727   :  { %v894_v17 = vrot.slane %v892_v14, 4  ;;  %v872_v21 = vadd.f32 %v870_v18, %v1446_v20 }
0x1729   :  { %895 = vrot.lane.b32.xlu1 %v894_v17, %s1230_s2  ;;  %v1133_v22 = vmul.f32 -1.442695, %v872_v21 }
0x172b   :  { %1210 = vpow2.f32 %v1133_v22 }
0x1731   :  { %v1211_v23 = vpop.eup %1210 }
0x1732   :  { %v876_v24 = vadd.f32 1.0, %v1211_v23 }
0x1734   :  { %1212 = vrcp.f32 %v876_v24  ;;  %v888_v29 = vand.u32 2147483648, %v876_v24  ;;  %vm882_vm8 = vweird.f32 %v876_v24  ;;  %v886_v30 = vand.u32 2147483647, %v876_v24 }
0x1736   :  { %v889_v42 = vor.u32 1.1754944e-38, %v888_v29  ;;  %vm887_vm9 = vcmp.eq.f32.partialorder %v886_v30, 8.507059e+37 }
0x173a   :  { %v1213_v25 = vpop.eup %1212 }
0x173b   :  { %v878_v26 = vmul.f32 %v1213_v25, %v876_v24  ;;  %vm883_vm7 = vweird.f32 %v1213_v25  ;;  %v129_v24 = vadd.f32 %v1442_v19, %v1338_v7 }
0x173c   :  { %vm884_vm3 = vmor %vm882_vm8, %vm883_vm7  ;;  %vm1100_vm7 = vcmask 41984  }
0x173d   :  { %v879_v27 = vsub.f32 1.0, %v878_v26 }
0x173f   :  { %v880_v28 = vmul.f32 %v1213_v25, %v879_v27 }
0x1741   :  { %v881_v11 = vadd.f32 %v1213_v25, %v880_v28 }
0x1743   :  { %v885_v31 = vsel %vm884_vm3, %v1213_v25, %v881_v11  ;;  %v1061_v11 = vld [vmem:[%s1518_s11] sm:$0xff] }
0x1744   :  { %v890_v33 = vsel %vm887_vm9, %v889_v42, %v885_v31  ;;  %1091 = vmatpush.msrb.mxu1 %v1061_v11 }
0x1745   :  { %v905_v38 = vsub.f32 1.0, %v890_v33  ;;  %v913_v41 = vmul.f32 %v911_v39, %v890_v33 }
0x179b   :  { %v896_v32 = vpop.permute.xlu1 %895 }
0x179c   :  { %v898_v34 = vmul.f32 %v896_v32, %v890_v33 }
0x179e   :  { %900 = vrot.lane.b32.xlu2 %v898_v34, %s1228_s3 }
0x17f8   :  { %v901_v35 = vpop.permute.xlu2 %900 }
0x17f9   :  { %v903_v36 = vadd.f32 %v901_v35, %v1446_v20 }
0x17fb   :  { %1214 = vtanh.f32 %v903_v36 }
0x1801   :  { %v1215_v37 = vpop.eup %1214 }
0x1802   :  { %907 = vrot.lane.b32.xlu0 %v1215_v37, %s1231_s4 }
0x1874   :  { %v908_v40 = vpop.permute.xlu0 %907 }
0x1875   :  { %v910_v44 = vmul.f32 %v908_v40, %v905_v38 }
0x1877   :  { %v914_v45 = vadd.f32 %v913_v41, %v910_v44  ;;  %v1149_v41 = vld [vmem:[%s1519_s12] ss:$0 sm:$0xff] }
0x1879   :  { %v916_v47 = vrot.slane %v914_v45, 4  ;;  %v1057_v48 = vsel %vm1056_vm11, %v1055_v46, %v914_v45  ;;  %v983_v1 = vrot.slane %v914_v45, 6 }
0x187b   :  { %917 = vrot.lane.b32.xlu1 %v916_v47, %s1231_s4 }
0x18ed   :  { %v918_v49 = vpop.permute.xlu1 %917 }
0x18ee   :  { %1134 = vmatmul.msk.f32.vlgmr.msrb.gmra.mxu3 %vm131_vm4, %v918_v49 }
0x1971   :  { %v938_v50 = vpop.f32.mrf.mxu3 }
0x1972   :  { %v942_v51 = vrot.slane %v938_v50, 2  ;;  %v964_v52 = vadd.f32 %v938_v50, %v1435_v15 }
0x1974   :  { %v944_v53 = vadd.f32 %v942_v51, %v1446_v20  ;;  %v966_v54 = vrot.slane %v964_v52, 2 }
0x1976   :  { %v1135_v55 = vmul.f32 -1.442695, %v944_v53  ;;  %967 = vrot.lane.b32.xlu2 %v966_v54, %s1230_s2 }
0x1978   :  { %1216 = vpow2.f32 %v1135_v55 }
0x197e   :  { %v1217_v56 = vpop.eup %1216 }
0x197f   :  { %v948_v43 = vadd.f32 1.0, %v1217_v56 }
0x1981   :  { %1218 = vrcp.f32 %v948_v43  ;;  %v960_v59 = vand.u32 2147483648, %v948_v43  ;;  %v958_v61 = vand.u32 2147483647, %v948_v43  ;;  %vm954_vm13 = vweird.f32 %v948_v43 }
0x1983   :  { %v961_v63 = vor.u32 1.1754944e-38, %v960_v59  ;;  %vm959_vm15 = vcmp.eq.f32.partialorder %v958_v61, 8.507059e+37 }
0x1987   :  { %v1219_v57 = vpop.eup %1218 }
0x1988   :  { %v950_v58 = vmul.f32 %v1219_v57, %v948_v43  ;;  %vm955_vm12 = vweird.f32 %v1219_v57 }
0x1989   :  { %vm956_vm14 = vmor %vm954_vm13, %vm955_vm12 }
0x198a   :  { %v951_v8 = vsub.f32 1.0, %v950_v58 }
0x198c   :  { %v952_v60 = vmul.f32 %v1219_v57, %v951_v8 }
0x198e   :  { %v953_v62 = vadd.f32 %v1219_v57, %v952_v60 }
0x1990   :  { %v957_v0 = vsel %vm956_vm14, %v1219_v57, %v953_v62 }
0x1991   :  { %v962_v2 = vsel %vm959_vm15, %v961_v63, %v957_v0 }
0x1992   :  { %v985_v3 = vmul.f32 %v983_v1, %v962_v2  ;;  %v977_v12 = vsub.f32 1.0, %v962_v2 }
0x19d0   :  { %v968_v4 = vpop.permute.xlu2 %967 }
0x19d1   :  { %v970_v5 = vmul.f32 %v968_v4, %v962_v2 }
0x19d3   :  { %972 = vrot.lane.b32.xlu0 %v970_v5, %s1228_s3 }
0x1a45   :  { %v973_v6 = vpop.permute.xlu0 %972 }
0x1a46   :  { %v975_v9 = vadd.f32 %v973_v6, %v1446_v20 }
0x1a48   :  { %1220 = vtanh.f32 %v975_v9 }
0x1a4e   :  { %v1221_v10 = vpop.eup %1220 }
0x1a4f   :  { %979 = vrot.lane.b32.xlu1 %v1221_v10, %s1231_s4 }
0x1ac1   :  { %v980_v16 = vpop.permute.xlu1 %979 }
0x1ac2   :  { %v982_v13 = vmul.f32 %v980_v16, %v977_v12 }
0x1ac4   :  { %v986_v14 = vadd.f32 %v985_v3, %v982_v13 }
0x1ac6   :  { %v988_v17 = vrot.slane %v986_v14, 6  ;;  %v1058_v18 = vsel %vm104_vm0, %v1057_v48, %v986_v14 }
0x1ac7   :  { %v1059_v20 = vmax.f32 %v1058_v18, 0.0 }
0x1ac8   :  { %989 = vrot.lane.b32.xlu2 %v988_v17, %s1231_s4 }
0x1b22   :  { %v990_v21 = vpop.permute.xlu2 %989 }
0x1b23   :  { %1136 = vmatmul.msk.f32.vlgmr.msrb.gmra.mxu0 %vm131_vm4, %v990_v21 }
0x1ba0   :  { %v1010_v22 = vpop.f32.mrf.mxu0 }
0x1ba1   :  { %v1033_v23 = vadd.f32 %v1010_v22, %v1435_v15  ;;  %v1013_v25 = vadd.f32 %v1010_v22, %v129_v24 }
0x1ba3   :  { %1035 = vrot.lane.b32.xlu0 %v1033_v23, %s1230_s2  ;;  %v1137_v26 = vmul.f32 -1.442695, %v1013_v25 }
0x1ba5   :  { %1222 = vpow2.f32 %v1137_v26 }
0x1bab   :  { %1068 = vrot.lane.b32.xlu0 %v1059_v20, %s1231_s4  ;;  %v1223_v27 = vpop.eup %1222 }
0x1bac   :  { %v1017_v28 = vadd.f32 1.0, %v1223_v27 }
0x1bae   :  { %1224 = vrcp.f32 %v1017_v28  ;;  %v1029_v32 = vand.u32 2147483648, %v1017_v28  ;;  %vm1023_vm2 = vweird.f32 %v1017_v28  ;;  %v1027_v7 = vand.u32 2147483647, %v1017_v28 }
0x1bb0   :  { %v1030_v33 = vor.u32 1.1754944e-38, %v1029_v32  ;;  %vm1028_vm6 = vcmp.eq.f32.partialorder %v1027_v7, 8.507059e+37 }
0x1bb4   :  { %v1225_v15 = vpop.eup %1224 }
0x1bb5   :  { %v1019_v29 = vmul.f32 %v1225_v15, %v1017_v28  ;;  %vm1024_vm0 = vweird.f32 %v1225_v15 }
0x1bb6   :  { %vm1025_vm5 = vmor %vm1023_vm2, %vm1024_vm0 }
0x1bb7   :  { %v1020_v30 = vsub.f32 1.0, %v1019_v29 }
0x1bb9   :  { %v1021_v31 = vmul.f32 %v1225_v15, %v1020_v30 }
0x1bbb   :  { %v1022_v42 = vadd.f32 %v1225_v15, %v1021_v31 }
0x1bbd   :  { %v1026_v19 = vsel %vm1025_vm5, %v1225_v15, %v1022_v42 }
0x1bbe   :  { %v1031_v35 = vsel %vm1028_vm6, %v1030_v33, %v1026_v19 }
0x1bbf   :  { %v1045_v46 = vsub.f32 1.0, %v1031_v35  ;;  %v1052_v48 = vmul.f32 %v1031_v35, %v988_v17 }
0x1c15   :  { %v1036_v34 = vpop.permute.xlu0 %1035 }
0x1c16   :  { %v1038_v36 = vmul.f32 %v1036_v34, %v1031_v35 }
0x1c18   :  { %1040 = vrot.lane.b32.xlu1 %v1038_v36, %s1228_s3 }
0x1c1d   :  { %v1069_v37 = vpop.permute.xlu0 %1068 }
0x1c1e   :  { %1138 = vmatmul.msk.f32.vlgmr.msrb.gmra.mxu1 %vm131_vm4, %v1069_v37 }
0x1c8a   :  { %v1041_v38 = vpop.permute.xlu1 %1040 }
0x1c8b   :  { %v1043_v39 = vadd.f32 %v1041_v38, %v129_v24 }
0x1c8d   :  { %1226 = vtanh.f32 %v1043_v39 }
0x1c93   :  { %v1227_v40 = vpop.eup %1226 }
0x1c94   :  { %1047 = vrot.lane.b32.xlu2 %v1227_v40, %s1231_s4 }
0x1c9b   :  { %v1093_v44 = vpop.f32.mrf.mxu1 }
0x1c9c   :  { %v1094_v45 = vadd.f32 %v1149_v41, %v1093_v44 }
0x1c9e   :  { %1099 = vst.msk [vmem:[%s1520_s13] sm:$0xff] %vm97_vm1, %v1094_v45 }
0x1cee   :  { %v1048_v47 = vpop.permute.xlu2 %1047 }
0x1cef   :  { %v1050_v49 = vmul.f32 %v1048_v47, %v1045_v46 }
0x1cf1   :  { %v1053_v50 = vadd.f32 %v1052_v48, %v1050_v49 }
0x1cf3   :  { %v1060_v51 = vmax.f32 %v1053_v50, 0.0 }
0x1cf5   :  { %1070 = vrot.lane.b32.xlu1 %v1060_v51, %s1231_s4 }
0x1d67   :  { %v1071_v52 = vpop.permute.xlu1 %1070 }
0x1d68   :  { %1139 = vmatmul.msk.f32.gmra.mxu1 %vm131_vm4, %v1071_v52 }
0x1de5   :  { %v1096_v53 = vpop.f32.mrf.mxu1 }
0x1de6   :  { %v1097_v54 = vadd.f32 %v1149_v41, %v1096_v53 }
0x1de8   :  { %1101 = vst.msk [vmem:[%s1520_s13 + $0x8] sm:$0x3] %vm1100_vm7, %v1097_v54 }

</bundles_post_ra>
